<compile_context>
chip_gen: v6e
topology: v6e:2x2x1
jax: 0.10.0
libtpu: 0.0.40
codegen_flags: <defaults>
</compile_context>

<pallas_src>
import functools

import jax
import jax.numpy as jnp
from jax.experimental import pallas as pl
from jax.experimental.pallas import tpu as pltpu


def _upsample_matrix(n: int) -> jnp.ndarray:
    """(2n, n) matrix reproducing torch 2x bilinear upsample (align_corners=False), incl. edge clamp."""
    o = jnp.arange(2 * n)
    src = (o + 0.5) / 2.0 - 0.5
    i0 = jnp.floor(src)
    frac = src - i0
    i0c = jnp.clip(i0, 0, n - 1).astype(jnp.int32)
    i1c = jnp.clip(i0 + 1, 0, n - 1).astype(jnp.int32)
    U = jnp.zeros((2 * n, n), jnp.float32)
    U = U.at[o, i0c].add(1.0 - frac)
    U = U.at[o, i1c].add(frac)
    return U


def _shift_flat(x, off, hw):
    """xs[:, p] = x[:, (p + off) mod hw]; wrapped / out-of-image positions are masked by the caller.

    Two-slice funnel shift along the lane axis -- semantically identical to
    pltpu.roll(x, (-off) % hw, axis=1) (same vror/vsel hardware ops), written out explicitly.
    """
    if off % hw == 0:
        return x
    k = off % hw
    return jnp.concatenate([x[:, k:], x[:, :k]], axis=1)


def _upsample_block_kernel(x_ref, w_ref, b_ref, up_ref, o_ref, *, H, W):
    # x_ref : (NB, C_in, H*W)     input dtype (f32) -> cast to bf16 in-kernel
    # w_ref : (9, C_out, C_in)    bf16, tap-major conv weights (k = 3*ky + kx)
    # b_ref : (C_out, 1)          f32
    # up_ref: (H*W, 4*H*W)        bf16, kron(Uh, Uw)^T combined 2x-bilinear operator
    # o_ref : (NB, C_out, 4*H*W)  out_dtype (bf16 by default)
    NB = x_ref.shape[0]
    HW = H * W

    # Edge-validity predicates over the flat spatial (lane) index; computed once per grid step.
    pos = jax.lax.broadcasted_iota(jnp.int32, (1, HW), 1)
    col = (pos & (W - 1)) if (W & (W - 1)) == 0 else (pos % W)
    row_ok_up = pos >= W               # row - 1 >= 0
    row_ok_dn = pos < (H - 1) * W      # row + 1 <= H - 1
    col_ok_lf = col >= 1               # col - 1 >= 0
    col_ok_rt = col <= W - 2           # col + 1 <= W - 1

    for j in range(NB):                # static unroll over the images in this block
        x = x_ref[j].astype(jnp.bfloat16)                                  # (C_in, HW)

        # ---- 3x3 conv, padding=1: 9 accumulated MXU dots on lane-shifted views of x ----
        acc = None
        for k in range(9):
            dy, dx = k // 3 - 1, k % 3 - 1
            xs = _shift_flat(x, dy * W + dx, HW)
            mask = None
            if dy == -1:
                mask = row_ok_up
            elif dy == 1:
                mask = row_ok_dn
            if dx == -1:
                mask = col_ok_lf if mask is None else mask & col_ok_lf
            elif dx == 1:
                mask = col_ok_rt if mask is None else mask & col_ok_rt
            if mask is not None:
                xs = jnp.where(mask, xs, 0)
            d = jnp.dot(w_ref[k], xs, preferred_element_type=jnp.float32)  # (C_out, HW) f32
            acc = d if acc is None else acc + d

        # ---- bias + ReLU (norm_layer = Identity, apply_blur = False -> Identity) ----
        y = jnp.maximum(acc + b_ref[...], 0.0).astype(jnp.bfloat16)        # (C_out, HW)

        # ---- 2x bilinear upsample (H + W directions + row interleave) as ONE MXU matmul ----
        up = jnp.dot(y, up_ref[...], preferred_element_type=jnp.float32)   # (C_out, 4*HW) f32
        o_ref[j] = up.astype(o_ref.dtype)


def upsample_block(x, w_conv, b_conv, *, out_dtype=jnp.bfloat16):
    """x: (N, C_in, H, W)  w_conv: (C_out, C_in, 3, 3)  b_conv: (C_out,) -> (N, C_out, 2H, 2W)."""
    N, C_in, H, W = x.shape
    C_out = w_conv.shape[0]
    HW, HW4 = H * W, 4 * H * W

    # Batch-block the grid: N/2 images per step -> >=2 parallel steps (both v7x TCs) + fatter DMAs.
    NB = N // 2 if (N >= 2 and N % 2 == 0) else 1

    # Wrapper glue: metadata-only reshapes and tiny constants only. No input cast, no padding,
    # no transposes of activation data.
    x_flat = x.reshape(N, C_in, HW)                                        # contiguous merge: free
    w9 = jnp.transpose(w_conv, (2, 3, 0, 1)).reshape(9, C_out, C_in).astype(jnp.bfloat16)
    b_r = b_conv.reshape(C_out, 1).astype(jnp.float32)
    # Combined 2x bilinear operator on the flat layout. Entries are in
    # {0, 1/16, 3/16, 1/4, 9/16, 3/4, 1}: all exact in bf16.
    up_op = jnp.kron(_upsample_matrix(H), _upsample_matrix(W)).T.astype(jnp.bfloat16)  # (HW, 4HW)

    kernel = functools.partial(_upsample_block_kernel, H=H, W=W)
    out_flat = pl.pallas_call(
        kernel,
        out_shape=jax.ShapeDtypeStruct((N, C_out, HW4), out_dtype),
        grid=(N // NB,),
        in_specs=[
            pl.BlockSpec((NB, C_in, HW), lambda n: (n, 0, 0)),
            # Grid-invariant operands (constant index maps -> fetched once across the grid). For
            # realistic sizes mark them pipeline_mode=pl.Buffered(1) to avoid double-buffering the
            # upsample operator inside v7x's 64 MiB VMEM.
            pl.BlockSpec((9, C_out, C_in), lambda n: (0, 0, 0)),
            pl.BlockSpec((C_out, 1), lambda n: (0, 0)),
            pl.BlockSpec((HW, HW4), lambda n: (0, 0)),
        ],
        out_specs=pl.BlockSpec((NB, C_out, HW4), lambda n: (n, 0, 0)),
        compiler_params=pltpu.CompilerParams(dimension_semantics=("parallel",)),
    )(x_flat, w9, b_r, up_op)

    # Metadata-only reshape back to NCHW.
    return out_flat.reshape(N, C_out, 2 * H, 2 * W)


if __name__ == "__main__":
    # Small deterministic example consistent with UpsampleBlock(in_ch=4, out_ch=8)
    N, C_in, C_out, H, W = 2, 4, 8, 16, 16
    key = jax.random.PRNGKey(0)
    kx, kw, kb = jax.random.split(key, 3)
    x = jax.random.normal(kx, (N, C_in, H, W), jnp.float32)
    w_conv = jax.random.normal(kw, (C_out, C_in, 3, 3), jnp.float32) * 0.1
    b_conv = jax.random.normal(kb, (C_out,), jnp.float32) * 0.1

    out = upsample_block(x, w_conv, b_conv)
    out = jax.block_until_ready(out)
    assert out.shape == (N, C_out, 2 * H, 2 * W)
    assert out.dtype == jnp.bfloat16

    # Pure-JAX reference. The kernel uses bf16 MXU operands (f32 accumulation) and bf16 writeback,
    # so build the reference from bf16-rounded x/w and compare with a correspondingly loose tolerance.
    xq = x.astype(jnp.bfloat16).astype(jnp.float32)
    wq = w_conv.astype(jnp.bfloat16).astype(jnp.float32)
    ref = jax.lax.conv_general_dilated(
        xq, wq, window_strides=(1, 1), padding=((1, 1), (1, 1)),
        dimension_numbers=('NCHW', 'OIHW', 'NCHW'))
    ref = jnp.maximum(ref + b_conv[None, :, None, None], 0.0)
    Uh = _upsample_matrix(H)
    Uw = _upsample_matrix(W)
    ref_up = jnp.einsum('ph,nchw,qw->ncpq', Uh, ref, Uw)
    assert jnp.allclose(out.astype(jnp.float32), ref_up, atol=2e-2, rtol=2e-2), \
        "mismatch vs JAX reference"

    print("KERNEL_OK")
</pallas_src>

<mosaic_0001>
module attributes {stable_mosaic.version = 11 : i64} {
  func.func @_upsample_block_kernel(%arg0: i32, %arg1: memref<1x4x256xf32, #tpu.memory_space<vmem>>, %arg2: memref<9x8x4xbf16, #tpu.memory_space<vmem>>, %arg3: memref<8x1xf32, #tpu.memory_space<vmem>>, %arg4: memref<256x1024xbf16, #tpu.memory_space<vmem>>, %arg5: memref<1x8x1024xbf16, #tpu.memory_space<vmem>>) attributes {dimension_semantics = [#tpu.dimension_semantics<parallel>], iteration_bounds = array<i64: 2>, scalar_prefetch = 0 : i64, scratch_operands = 0 : i64, tpu.core_type = #tpu.core_type<tc>, window_params = [{transform_indices = @transform_0, window_bounds = array<i64: 1, 4, 256>}, {pipeline_mode = #tpu.pipeline_mode<synchronous>, transform_indices = @transform_1, window_bounds = array<i64: 9, 8, 4>}, {pipeline_mode = #tpu.pipeline_mode<synchronous>, transform_indices = @transform_2, window_bounds = array<i64: 8, 1>}, {pipeline_mode = #tpu.pipeline_mode<synchronous>, transform_indices = @transform_3, window_bounds = array<i64: 256, 1024>}, {transform_indices = @transform_4, window_bounds = array<i64: 1, 8, 1024>}]} {
    %0 = tpu.iota {dimensions = array<i32: 1>} : vector<1x256xi32>
    %c15_i32 = arith.constant 15 : i32
    %1 = vector.broadcast %c15_i32 : i32 to vector<1x256xi32>
    %2 = arith.andi %0, %1 : vector<1x256xi32>
    %c16_i32 = arith.constant 16 : i32
    %3 = vector.broadcast %c16_i32 : i32 to vector<1x256xi32>
    %4 = arith.cmpi sge, %0, %3 : vector<1x256xi32>
    %c240_i32 = arith.constant 240 : i32
    %5 = vector.broadcast %c240_i32 : i32 to vector<1x256xi32>
    %6 = arith.cmpi slt, %0, %5 : vector<1x256xi32>
    %c1_i32 = arith.constant 1 : i32
    %7 = vector.broadcast %c1_i32 : i32 to vector<1x256xi32>
    %8 = arith.cmpi sge, %2, %7 : vector<1x256xi32>
    %c14_i32 = arith.constant 14 : i32
    %9 = vector.broadcast %c14_i32 : i32 to vector<1x256xi32>
    %10 = arith.cmpi sle, %2, %9 : vector<1x256xi32>
    %c0 = arith.constant 0 : index
    %c0_0 = arith.constant 0 : index
    %c0_1 = arith.constant 0 : index
    %11 = vector.load %arg1[%c0, %c0_0, %c0_1] : memref<1x4x256xf32, #tpu.memory_space<vmem>>, vector<1x4x256xf32>
    %12 = vector.shape_cast %11 : vector<1x4x256xf32> to vector<4x256xf32>
    %13 = arith.truncf %12 : vector<4x256xf32> to vector<4x256xbf16>
    %14 = vector.extract_strided_slice %13 {offsets = [0, 239], sizes = [4, 17], strides = [1, 1]} : vector<4x256xbf16> to vector<4x17xbf16>
    %15 = vector.extract_strided_slice %13 {offsets = [0, 0], sizes = [4, 239], strides = [1, 1]} : vector<4x256xbf16> to vector<4x239xbf16>
    %16 = tpu.concatenate %14, %15 in 1 : vector<4x17xbf16>, vector<4x239xbf16> -> vector<4x256xbf16>
    %17 = arith.andi %4, %8 : vector<1x256xi1>
    %c0_i32 = arith.constant 0 : i32
    %18 = arith.sitofp %c0_i32 : i32 to bf16
    %19 = vector.shape_cast %17 : vector<1x256xi1> to vector<1x256xi1>
    %20 = vector.broadcast %19 : vector<1x256xi1> to vector<4x256xi1>
    %21 = vector.broadcast %18 : bf16 to vector<4x256xbf16>
    %22 = arith.select %20, %16, %21 : vector<4x256xi1>, vector<4x256xbf16>
    %c0_2 = arith.constant 0 : index
    %c0_3 = arith.constant 0 : index
    %c0_4 = arith.constant 0 : index
    %23 = vector.load %arg2[%c0_2, %c0_3, %c0_4] : memref<9x8x4xbf16, #tpu.memory_space<vmem>>, vector<1x8x4xbf16>
    %24 = vector.shape_cast %23 : vector<1x8x4xbf16> to vector<8x4xbf16>
    %cst = arith.constant dense<0.000000e+00> : vector<8x256xf32>
    %25 = tpu.matmul %24, %22, %cst {dimension_numbers = #tpu.dot_dimension_numbers<[1], [0], [0], [1], [0, 0, 1, 1], [], []>} : vector<8x4xbf16>, vector<4x256xbf16>, vector<8x256xf32> -> vector<8x256xf32>
    %26 = vector.extract_strided_slice %13 {offsets = [0, 240], sizes = [4, 16], strides = [1, 1]} : vector<4x256xbf16> to vector<4x16xbf16>
    %27 = vector.extract_strided_slice %13 {offsets = [0, 0], sizes = [4, 240], strides = [1, 1]} : vector<4x256xbf16> to vector<4x240xbf16>
    %28 = tpu.concatenate %26, %27 in 1 : vector<4x16xbf16>, vector<4x240xbf16> -> vector<4x256xbf16>
    %c0_i32_5 = arith.constant 0 : i32
    %29 = arith.sitofp %c0_i32_5 : i32 to bf16
    %30 = vector.shape_cast %4 : vector<1x256xi1> to vector<1x256xi1>
    %31 = vector.broadcast %30 : vector<1x256xi1> to vector<4x256xi1>
    %32 = vector.broadcast %29 : bf16 to vector<4x256xbf16>
    %33 = arith.select %31, %28, %32 : vector<4x256xi1>, vector<4x256xbf16>
    %c1 = arith.constant 1 : index
    %c0_6 = arith.constant 0 : index
    %c0_7 = arith.constant 0 : index
    %34 = vector.load %arg2[%c1, %c0_6, %c0_7] : memref<9x8x4xbf16, #tpu.memory_space<vmem>>, vector<1x8x4xbf16>
    %35 = vector.shape_cast %34 : vector<1x8x4xbf16> to vector<8x4xbf16>
    %cst_8 = arith.constant dense<0.000000e+00> : vector<8x256xf32>
    %36 = tpu.matmul %35, %33, %cst_8 {dimension_numbers = #tpu.dot_dimension_numbers<[1], [0], [0], [1], [0, 0, 1, 1], [], []>} : vector<8x4xbf16>, vector<4x256xbf16>, vector<8x256xf32> -> vector<8x256xf32>
    %37 = arith.addf %25, %36 : vector<8x256xf32>
    %38 = vector.extract_strided_slice %13 {offsets = [0, 241], sizes = [4, 15], strides = [1, 1]} : vector<4x256xbf16> to vector<4x15xbf16>
    %39 = vector.extract_strided_slice %13 {offsets = [0, 0], sizes = [4, 241], strides = [1, 1]} : vector<4x256xbf16> to vector<4x241xbf16>
    %40 = tpu.concatenate %38, %39 in 1 : vector<4x15xbf16>, vector<4x241xbf16> -> vector<4x256xbf16>
    %41 = arith.andi %4, %10 : vector<1x256xi1>
    %c0_i32_9 = arith.constant 0 : i32
    %42 = arith.sitofp %c0_i32_9 : i32 to bf16
    %43 = vector.shape_cast %41 : vector<1x256xi1> to vector<1x256xi1>
    %44 = vector.broadcast %43 : vector<1x256xi1> to vector<4x256xi1>
    %45 = vector.broadcast %42 : bf16 to vector<4x256xbf16>
    %46 = arith.select %44, %40, %45 : vector<4x256xi1>, vector<4x256xbf16>
    %c2 = arith.constant 2 : index
    %c0_10 = arith.constant 0 : index
    %c0_11 = arith.constant 0 : index
    %47 = vector.load %arg2[%c2, %c0_10, %c0_11] : memref<9x8x4xbf16, #tpu.memory_space<vmem>>, vector<1x8x4xbf16>
    %48 = vector.shape_cast %47 : vector<1x8x4xbf16> to vector<8x4xbf16>
    %cst_12 = arith.constant dense<0.000000e+00> : vector<8x256xf32>
    %49 = tpu.matmul %48, %46, %cst_12 {dimension_numbers = #tpu.dot_dimension_numbers<[1], [0], [0], [1], [0, 0, 1, 1], [], []>} : vector<8x4xbf16>, vector<4x256xbf16>, vector<8x256xf32> -> vector<8x256xf32>
    %50 = arith.addf %37, %49 : vector<8x256xf32>
    %51 = vector.extract_strided_slice %13 {offsets = [0, 255], sizes = [4, 1], strides = [1, 1]} : vector<4x256xbf16> to vector<4x1xbf16>
    %52 = vector.extract_strided_slice %13 {offsets = [0, 0], sizes = [4, 255], strides = [1, 1]} : vector<4x256xbf16> to vector<4x255xbf16>
    %53 = tpu.concatenate %51, %52 in 1 : vector<4x1xbf16>, vector<4x255xbf16> -> vector<4x256xbf16>
    %c0_i32_13 = arith.constant 0 : i32
    %54 = arith.sitofp %c0_i32_13 : i32 to bf16
    %55 = vector.shape_cast %8 : vector<1x256xi1> to vector<1x256xi1>
    %56 = vector.broadcast %55 : vector<1x256xi1> to vector<4x256xi1>
    %57 = vector.broadcast %54 : bf16 to vector<4x256xbf16>
    %58 = arith.select %56, %53, %57 : vector<4x256xi1>, vector<4x256xbf16>
    %c3 = arith.constant 3 : index
    %c0_14 = arith.constant 0 : index
    %c0_15 = arith.constant 0 : index
    %59 = vector.load %arg2[%c3, %c0_14, %c0_15] : memref<9x8x4xbf16, #tpu.memory_space<vmem>>, vector<1x8x4xbf16>
    %60 = vector.shape_cast %59 : vector<1x8x4xbf16> to vector<8x4xbf16>
    %cst_16 = arith.constant dense<0.000000e+00> : vector<8x256xf32>
    %61 = tpu.matmul %60, %58, %cst_16 {dimension_numbers = #tpu.dot_dimension_numbers<[1], [0], [0], [1], [0, 0, 1, 1], [], []>} : vector<8x4xbf16>, vector<4x256xbf16>, vector<8x256xf32> -> vector<8x256xf32>
    %62 = arith.addf %50, %61 : vector<8x256xf32>
    %c4 = arith.constant 4 : index
    %c0_17 = arith.constant 0 : index
    %c0_18 = arith.constant 0 : index
    %63 = vector.load %arg2[%c4, %c0_17, %c0_18] : memref<9x8x4xbf16, #tpu.memory_space<vmem>>, vector<1x8x4xbf16>
    %64 = vector.shape_cast %63 : vector<1x8x4xbf16> to vector<8x4xbf16>
    %cst_19 = arith.constant dense<0.000000e+00> : vector<8x256xf32>
    %65 = tpu.matmul %64, %13, %cst_19 {dimension_numbers = #tpu.dot_dimension_numbers<[1], [0], [0], [1], [0, 0, 1, 1], [], []>} : vector<8x4xbf16>, vector<4x256xbf16>, vector<8x256xf32> -> vector<8x256xf32>
    %66 = arith.addf %62, %65 : vector<8x256xf32>
    %67 = vector.extract_strided_slice %13 {offsets = [0, 1], sizes = [4, 255], strides = [1, 1]} : vector<4x256xbf16> to vector<4x255xbf16>
    %68 = vector.extract_strided_slice %13 {offsets = [0, 0], sizes = [4, 1], strides = [1, 1]} : vector<4x256xbf16> to vector<4x1xbf16>
    %69 = tpu.concatenate %67, %68 in 1 : vector<4x255xbf16>, vector<4x1xbf16> -> vector<4x256xbf16>
    %c0_i32_20 = arith.constant 0 : i32
    %70 = arith.sitofp %c0_i32_20 : i32 to bf16
    %71 = vector.shape_cast %10 : vector<1x256xi1> to vector<1x256xi1>
    %72 = vector.broadcast %71 : vector<1x256xi1> to vector<4x256xi1>
    %73 = vector.broadcast %70 : bf16 to vector<4x256xbf16>
    %74 = arith.select %72, %69, %73 : vector<4x256xi1>, vector<4x256xbf16>
    %c5 = arith.constant 5 : index
    %c0_21 = arith.constant 0 : index
    %c0_22 = arith.constant 0 : index
    %75 = vector.load %arg2[%c5, %c0_21, %c0_22] : memref<9x8x4xbf16, #tpu.memory_space<vmem>>, vector<1x8x4xbf16>
    %76 = vector.shape_cast %75 : vector<1x8x4xbf16> to vector<8x4xbf16>
    %cst_23 = arith.constant dense<0.000000e+00> : vector<8x256xf32>
    %77 = tpu.matmul %76, %74, %cst_23 {dimension_numbers = #tpu.dot_dimension_numbers<[1], [0], [0], [1], [0, 0, 1, 1], [], []>} : vector<8x4xbf16>, vector<4x256xbf16>, vector<8x256xf32> -> vector<8x256xf32>
    %78 = arith.addf %66, %77 : vector<8x256xf32>
    %79 = vector.extract_strided_slice %13 {offsets = [0, 15], sizes = [4, 241], strides = [1, 1]} : vector<4x256xbf16> to vector<4x241xbf16>
    %80 = vector.extract_strided_slice %13 {offsets = [0, 0], sizes = [4, 15], strides = [1, 1]} : vector<4x256xbf16> to vector<4x15xbf16>
    %81 = tpu.concatenate %79, %80 in 1 : vector<4x241xbf16>, vector<4x15xbf16> -> vector<4x256xbf16>
    %82 = arith.andi %6, %8 : vector<1x256xi1>
    %c0_i32_24 = arith.constant 0 : i32
    %83 = arith.sitofp %c0_i32_24 : i32 to bf16
    %84 = vector.shape_cast %82 : vector<1x256xi1> to vector<1x256xi1>
    %85 = vector.broadcast %84 : vector<1x256xi1> to vector<4x256xi1>
    %86 = vector.broadcast %83 : bf16 to vector<4x256xbf16>
    %87 = arith.select %85, %81, %86 : vector<4x256xi1>, vector<4x256xbf16>
    %c6 = arith.constant 6 : index
    %c0_25 = arith.constant 0 : index
    %c0_26 = arith.constant 0 : index
    %88 = vector.load %arg2[%c6, %c0_25, %c0_26] : memref<9x8x4xbf16, #tpu.memory_space<vmem>>, vector<1x8x4xbf16>
    %89 = vector.shape_cast %88 : vector<1x8x4xbf16> to vector<8x4xbf16>
    %cst_27 = arith.constant dense<0.000000e+00> : vector<8x256xf32>
    %90 = tpu.matmul %89, %87, %cst_27 {dimension_numbers = #tpu.dot_dimension_numbers<[1], [0], [0], [1], [0, 0, 1, 1], [], []>} : vector<8x4xbf16>, vector<4x256xbf16>, vector<8x256xf32> -> vector<8x256xf32>
    %91 = arith.addf %78, %90 : vector<8x256xf32>
    %92 = vector.extract_strided_slice %13 {offsets = [0, 16], sizes = [4, 240], strides = [1, 1]} : vector<4x256xbf16> to vector<4x240xbf16>
    %93 = vector.extract_strided_slice %13 {offsets = [0, 0], sizes = [4, 16], strides = [1, 1]} : vector<4x256xbf16> to vector<4x16xbf16>
    %94 = tpu.concatenate %92, %93 in 1 : vector<4x240xbf16>, vector<4x16xbf16> -> vector<4x256xbf16>
    %c0_i32_28 = arith.constant 0 : i32
    %95 = arith.sitofp %c0_i32_28 : i32 to bf16
    %96 = vector.shape_cast %6 : vector<1x256xi1> to vector<1x256xi1>
    %97 = vector.broadcast %96 : vector<1x256xi1> to vector<4x256xi1>
    %98 = vector.broadcast %95 : bf16 to vector<4x256xbf16>
    %99 = arith.select %97, %94, %98 : vector<4x256xi1>, vector<4x256xbf16>
    %c7 = arith.constant 7 : index
    %c0_29 = arith.constant 0 : index
    %c0_30 = arith.constant 0 : index
    %100 = vector.load %arg2[%c7, %c0_29, %c0_30] : memref<9x8x4xbf16, #tpu.memory_space<vmem>>, vector<1x8x4xbf16>
    %101 = vector.shape_cast %100 : vector<1x8x4xbf16> to vector<8x4xbf16>
    %cst_31 = arith.constant dense<0.000000e+00> : vector<8x256xf32>
    %102 = tpu.matmul %101, %99, %cst_31 {dimension_numbers = #tpu.dot_dimension_numbers<[1], [0], [0], [1], [0, 0, 1, 1], [], []>} : vector<8x4xbf16>, vector<4x256xbf16>, vector<8x256xf32> -> vector<8x256xf32>
    %103 = arith.addf %91, %102 : vector<8x256xf32>
    %104 = vector.extract_strided_slice %13 {offsets = [0, 17], sizes = [4, 239], strides = [1, 1]} : vector<4x256xbf16> to vector<4x239xbf16>
    %105 = vector.extract_strided_slice %13 {offsets = [0, 0], sizes = [4, 17], strides = [1, 1]} : vector<4x256xbf16> to vector<4x17xbf16>
    %106 = tpu.concatenate %104, %105 in 1 : vector<4x239xbf16>, vector<4x17xbf16> -> vector<4x256xbf16>
    %107 = arith.andi %6, %10 : vector<1x256xi1>
    %c0_i32_32 = arith.constant 0 : i32
    %108 = arith.sitofp %c0_i32_32 : i32 to bf16
    %109 = vector.shape_cast %107 : vector<1x256xi1> to vector<1x256xi1>
    %110 = vector.broadcast %109 : vector<1x256xi1> to vector<4x256xi1>
    %111 = vector.broadcast %108 : bf16 to vector<4x256xbf16>
    %112 = arith.select %110, %106, %111 : vector<4x256xi1>, vector<4x256xbf16>
    %c8 = arith.constant 8 : index
    %c0_33 = arith.constant 0 : index
    %c0_34 = arith.constant 0 : index
    %113 = vector.load %arg2[%c8, %c0_33, %c0_34] : memref<9x8x4xbf16, #tpu.memory_space<vmem>>, vector<1x8x4xbf16>
    %114 = vector.shape_cast %113 : vector<1x8x4xbf16> to vector<8x4xbf16>
    %cst_35 = arith.constant dense<0.000000e+00> : vector<8x256xf32>
    %115 = tpu.matmul %114, %112, %cst_35 {dimension_numbers = #tpu.dot_dimension_numbers<[1], [0], [0], [1], [0, 0, 1, 1], [], []>} : vector<8x4xbf16>, vector<4x256xbf16>, vector<8x256xf32> -> vector<8x256xf32>
    %116 = arith.addf %103, %115 : vector<8x256xf32>
    %c0_36 = arith.constant 0 : index
    %c0_37 = arith.constant 0 : index
    %117 = vector.load %arg3[%c0_36, %c0_37] : memref<8x1xf32, #tpu.memory_space<vmem>>, vector<8x1xf32>
    %118 = vector.broadcast %117 : vector<8x1xf32> to vector<8x256xf32>
    %119 = arith.addf %116, %118 : vector<8x256xf32>
    %cst_38 = arith.constant 0.000000e+00 : f32
    %120 = vector.broadcast %cst_38 : f32 to vector<8x256xf32>
    %121 = arith.maximumf %119, %120 : vector<8x256xf32>
    %122 = arith.truncf %121 : vector<8x256xf32> to vector<8x256xbf16>
    %c0_39 = arith.constant 0 : index
    %c0_40 = arith.constant 0 : index
    %123 = vector.load %arg4[%c0_39, %c0_40] : memref<256x1024xbf16, #tpu.memory_space<vmem>>, vector<256x1024xbf16>
    %cst_41 = arith.constant dense<0.000000e+00> : vector<8x1024xf32>
    %124 = tpu.matmul %122, %123, %cst_41 {dimension_numbers = #tpu.dot_dimension_numbers<[1], [0], [0], [1], [0, 0, 1, 1], [], []>} : vector<8x256xbf16>, vector<256x1024xbf16>, vector<8x1024xf32> -> vector<8x1024xf32>
    %125 = arith.truncf %124 : vector<8x1024xf32> to vector<8x1024xbf16>
    %c0_42 = arith.constant 0 : index
    %c0_43 = arith.constant 0 : index
    %c0_44 = arith.constant 0 : index
    %126 = vector.load %arg5[%c0_42, %c0_43, %c0_44] : memref<1x8x1024xbf16, #tpu.memory_space<vmem>>, vector<1x8x1024xbf16>
    %127 = vector.shape_cast %126 : vector<1x8x1024xbf16> to vector<8x1024xbf16>
    %128 = vector.shape_cast %125 : vector<8x1024xbf16> to vector<1x8x1024xbf16>
    tpu.vector_store %arg5[%c0_42, %c0_43, %c0_44], %128 {strides = array<i32>} : memref<1x8x1024xbf16, #tpu.memory_space<vmem>>, vector<1x8x1024xbf16>,
    return
  }
  func.func @transform_0(%arg0: i32) -> (i32, i32, i32) {
    %c0_i32 = arith.constant 0 : i32
    %c0_i32_0 = arith.constant 0 : i32
    %c0_i32_1 = arith.constant 0 : i32
    return %arg0, %c0_i32, %c0_i32_0 : i32, i32, i32
  }
  func.func @transform_1(%arg0: i32) -> (i32, i32, i32) {
    %c0_i32 = arith.constant 0 : i32
    %c0_i32_0 = arith.constant 0 : i32
    %c0_i32_1 = arith.constant 0 : i32
    %c0_i32_2 = arith.constant 0 : i32
    return %c0_i32, %c0_i32_0, %c0_i32_1 : i32, i32, i32
  }
  func.func @transform_2(%arg0: i32) -> (i32, i32) {
    %c0_i32 = arith.constant 0 : i32
    %c0_i32_0 = arith.constant 0 : i32
    %c0_i32_1 = arith.constant 0 : i32
    return %c0_i32, %c0_i32_0 : i32, i32
  }
  func.func @transform_3(%arg0: i32) -> (i32, i32) {
    %c0_i32 = arith.constant 0 : i32
    %c0_i32_0 = arith.constant 0 : i32
    %c0_i32_1 = arith.constant 0 : i32
    return %c0_i32, %c0_i32_0 : i32, i32
  }
  func.func @transform_4(%arg0: i32) -> (i32, i32, i32) {
    %c0_i32 = arith.constant 0 : i32
    %c0_i32_0 = arith.constant 0 : i32
    %c0_i32_1 = arith.constant 0 : i32
    return %arg0, %c0_i32, %c0_i32_0 : i32, i32, i32
  }
}

</mosaic_0001>

<bundles_post_ra>
// kernel: tpu_custom_call.1
= control target key start
LH: loop header
LB: loop body
LE: loop exit
PB: predicated region body
PF: predicated region fallthrough
CT: control target
= control target key end

     0   :  { %9 = vsyncpa [#allocation3], 0  ;;  %s2847_s0 = inlined_call_operand.vmem [shape: f32[2,4,256], index: 0, kind: input, shape index: {}]   ;;  %s2848_s1 = inlined_call_operand.vmem [shape: bf16[9,8,4], index: 1, kind: input, shape index: {}]   ;;  %s2849_s2 = inlined_call_operand.vmem [shape: f32[8,1], index: 2, kind: input, shape index: {}]   ;;  %s2850_s3 = inlined_call_operand.hbm [shape: bf16[256,1024], index: 3, kind: input, shape index: {}]   ;;  %s2851_s4 = inlined_call_operand.hbm [shape: bf16[2,8,1024], index: 4, kind: output, shape index: {}]  }
   0x1   :  { %10 = vsyncpa [#allocation4], 0 }
   0x2   :  { %12 = vsyncpa [#allocation4 + $0x1], 0  ;;  %s2405_s15 = smov 0   ;;  %s2407_s16 = smov 0  }
   0x3   :  { %s2409_s17 = smov 0   ;;  %s2411_s18 = smov 0  }
   0x4 LB: > { %s2426_s19 = sadd.s32 4294967295, %s2364_s18   ;;  %s2032_s20 = sadd.s32 4294967294, %s2364_s18   ;;  %s2364_s18 = sphi %s2411_s18, %s2903_s18   ;;  %s2360_s17 = sphi %s2409_s17, %s2902_s17   ;;  %s2356_s16 = sphi %s2407_s16, %s2901_s16   ;;  %s2352_s15 = sphi %s2405_s15, %s2900_s15  }
   0x5   : > { %s2430_s21 = sadd.s32 1, %s2364_s18   ;;  %s114_s22 = sadd.s32 1, %s2360_s17 }
   0x6   : > { %s111_s23 = ssub.s32 %s2364_s18, %s2430_s21  ;;  %p124_p0 = scmp.ne.s32.totalorder %s2360_s17, %s2356_s16 }
   0x7   : > { %p112_p1 = scmp.eq.s32.totalorder %s111_s23, 0  ;;  %p125_p2 = scmp.eq.s32.totalorder %s2426_s19, 1 }
   0x8   : > { %p130_p3 = scmp.ne.s32.totalorder %s2356_s16, %s2352_s15  ;;  %p131_p4 = scmp.eq.s32.totalorder %s2032_s20, 1 }
   0x9   : > { %s2441_s24 = scalar_select %p112_p1, %s2360_s17, %s114_s22  }
   0xa   : > { %p2443_p5 = por %p125_p2, %p124_p0  ;;  %p2447_p6 = por %p131_p4, %p130_p3 }
   0xb   : > { %p2033_p7 = scmp.ge.s32.totalorder %s2364_s18, 1  ;;  %p138_p8 = scmp.lt.s32.totalorder %s2364_s18, 3 }
   0xc   : > { %s2853_s26 = scalar_select %p2447_p6, 1, 0 }
   0xd   : > { %p2224_p9 = scmp.eq.s32.totalorder %s2426_s19, 0  ;;  %p2454_p10 = pnand %p2033_p7, %p138_p8 }
   0xe   : > { %s2366_s28 = smov [#allocation2]  }
   0xf   : > { %s156_s29 = sshll.u32 %s2366_s28, 4  ;;  %p2216_p11 = pneg %p2454_p10  ;;  %s157_s29 = int_to_ptr.vmem [resolvable:$true] %s156_s29 }
  0x10   : > { %s2285_s30 = scalar_lea.vmem %s157_s29, 16384  ;;  %p2293_p3 = scmp.lt.s32.totalorder %s157_s29, %s157_s29 }
  0x11   : > { %p2217_p12 = pnand %p2224_p9, %p2216_p11  ;;  %p2286_p0 = scmp.ne.s32.totalorder %s157_s29, %s2285_s30 }
  0x12   : > { %p2294_p4 = scmp.lt.s32.totalorder %s2285_s30, %s2285_s30 }
  0x13   : > { %p2276_p13 = pneg %p2217_p12 }
  0x14   : > { %p2295_p6 = por %p2294_p4, %p2293_p3 }
  0x15   : > { %p2288_p1 = pnand %p2286_p0, %p2276_p13 }
  0x17   : > { %p2289_p2 = pneg %p2288_p1 }
  0x19   : > { %p2296_p7 = pnand %p2295_p6, %p2289_p2 }
  0x1b   : > { %2299 = shalt.err (!%p2296_p7)
}
  0x1c   : > { %s2367_s5 = smov 512   ;;  %s2368_s6 = smov 32  }
  0x1d   : > { %2219 = dma.hbm_to_vmem [thread:$0]  (!%p2217_p12), %s2850_s3, 16384, %s157_s29, [#allocation3], %s2367_s5, %s2367_s5, %s2368_s6  }
  0x1e   : > { %180 = sbr.rel (%p2454_p10) target bundleno = 683 (0x2ab), region = 36 }
  0x23   : > { %2343 = dma.done.wait (%p2224_p9), [#allocation3], 16384  }
  0x24   : > { %2345 = vsyncadd (%p2224_p9), [#allocation3], 4294950912  ;;  %p206_p8 = scmp.lt.s32.totalorder %s2426_s19, 1  ;;  %v2369_v0 = vmov 0   ;;  %s2370_s14 = smov 17   ;;  %v966_v5 = vld [vmem:[%s2849_s2] sm:$0xff]  ;;  %v214_v6 = vlaneseq }
  0x25   : > { %343 = vmatprep.mubr.bf16.mxu0 %v2369_v0  ;;  %393 = vmatprep.mubr.bf16.mxu1 %v2369_v0  ;;  %s2371_s20 = smov 16   ;;  %s2372_s22 = smov 15   ;;  %vm2378_vm6 = vmmov 1   ;;  %vm239_vm11 = vcmask 138240   ;;  %vm272_vm13 = vcmask 130048   ;;  %vm304_vm15 = vcmask 1041408  }
  0x26   : > { %s207_s9 = scalar_select %p206_p8, %s2426_s19, 1  ;;  %2272 = vset.pattern.permute.xlu0 %v2369_v0  ;;  %v215_v7 = vand.u32 127, %v214_v6  ;;  %v256_v13 = vshrl.u32 %v214_v6, 7  ;;  %v267_v47 = vld [vmem:[%s2848_s1] sm:$0xf]  ;;  %v1035_v62 = vld [vmem:[#allocation2 + $0x1c8] sm:$0xff] }
  0x27   : > { %s2373_s23 = smov 1   ;;  %s2374_s27 = smov 127   ;;  %v2041_v54 = vld [vmem:[%s2848_s1 + $0x4] sm:$0xf]  ;;  %v1015_v14 = vld [vmem:[#allocation2 + $0x128] sm:$0xff] }
  0x28   : > { %s2204_s10 = sshll.u32 %s207_s9, 3  ;;  %s2375_s28 = smov 113   ;;  %v2502_v8 = vadd.s32 128, %v215_v7  ;;  %v217_v9 = vand.u32 15, %v215_v7  ;;  %vm219_vm0 = vcmp.ge.s32.totalorder %v215_v7, 16  ;;  %v2522_v15 = vsub.s32 0, %v256_v13 }
  0x29   : > { %s210_s13 = scalar_lea.vmem %s2847_s0, %s2204_s10  ;;  %s2376_s29 = smov 112   ;;  %vm284_vm7 = vmpackc.low %vm2378_vm6, %vm219_vm0  ;;  %v2524_v16 = vsub.s32 4, %v256_v13 }
  0x2a   : > { %v227_v1 = vld [vmem:[%s210_s13] sm:$0xff]  ;;  %s2377_s30 = smov 111   ;;  %v218_v10 = vand.u32 15, %v2502_v8  ;;  %vm2505_vm1 = vcmp.ge.s32.totalorder %v217_v9, 1  ;;  %vm2515_vm4 = vcmp.le.s32.totalorder %v217_v9, 14  ;;  %v285_v19 = vsel %vm284_vm7, 65537, %v2369_v0 }
  0x2b   : > { %v2479_v2 = vpack.c.bf16 %v227_v1, %v227_v1  ;;  %v229_v3 = vcombine.high %v227_v1, %v227_v1  ;;  %vm247_vm3 = vmand %vm219_vm0, %vm2505_vm1  ;;  %v293_v23 = vrot.slane %v285_v19, %v2524_v16  ;;  %v289_v24 = vrot.slane %v285_v19, %v2522_v15  ;;  %v1027_v19 = vld [vmem:[#allocation2 + $0x188] sm:$0xff]  ;;  %s203_s8 = sand.u32 1, %s2356_s16   ;;  %s2209_s11 = sshll.u32 %s2426_s19, 9 }
  0x2c   : > { %vm2509_vm2 = vcmp.ge.s32.totalorder %v218_v10, 1  ;;  %vm2526_vm8 = vcmp.le.s32.totalorder %v218_v10, 14  ;;  %vm414_vm9 = vmand %vm219_vm0, %vm2515_vm4  ;;  %s2038_s9 = sshll.u32 %s203_s8, 5  ;;  %s1947_s19 = scalar_lea.sflag [#allocation4], %s203_s8 }
  0x2d   : > { %237 = vrot.lane.b32.xlu1 %v2479_v2, %s2370_s14  ;;  %v2482_v4 = vpack.c.bf16 %v229_v3, %v229_v3  ;;  %vm253_vm5 = vmpackc.low %vm2509_vm2, %vm247_vm3  ;;  %vm222_vm3 = vcmp.lt.s32.totalorder %v2502_v8, 240  ;;  %vm2558_vm7 = vcmp.ne.s16.totalorder %v289_v24, 0  ;;  %v2046_v8 = vld [vmem:[%s2848_s1 + $0x8] sm:$0xf]  ;;  %s205_s10 = scalar_lea.vmem [#allocation5], %s2038_s9 }
  0x2e   : > { %v254_v18 = vsel %vm253_vm5, 65537, %v2369_v0  ;;  %vm420_vm10 = vmpackc.low %vm2526_vm8, %vm414_vm9  ;;  %vm2554_vm5 = vcmp.ne.s16.totalorder %v293_v23, 0  ;;  %vm406_vm9 = vcmask 121856   ;;  %s1961_s12 = sshll.u32 %s205_s10, 4  ;;  %s2806_s12 = int_to_ptr.vmem [resolvable:$true] %s1961_s12 }
  0x2f   : > { %268 = vrot.lane.b32.xlu0 %v2482_v4, %s2371_s20  ;;  %v262_v20 = vrot.slane %v254_v18, %v2524_v16  ;;  %v258_v21 = vrot.slane %v254_v18, %v2522_v15  ;;  %v421_v25 = vsel %vm420_vm10, 65537, %v2369_v0  ;;  %vm504_vm12 = vmpackc.low %vm2509_vm2, %vm2505_vm1 }
  0x30   : > { %v425_v32 = vrot.slane %v421_v25, %v2522_v15  ;;  %v429_v35 = vrot.slane %v421_v25, %v2524_v16  ;;  %v505_v36 = vsel %vm504_vm12, 65537, %v2369_v0  ;;  %vm642_vm10 = vmpackc.low %vm2526_vm8, %vm2515_vm4  ;;  %v578_v25 = vsel %vm304_vm15, %v2479_v2, 0 }
  0x31   : > { %234 = vrot.lane.b32.xlu1 %v2482_v4, %s2370_s14  ;;  %vm2545_vm14 = vcmp.ne.s16.totalorder %v262_v20, 0  ;;  %vm2549_vm0 = vcmp.ne.s16.totalorder %v258_v21, 0  ;;  %vm2581_vm12 = vmand %vm222_vm3, %vm2509_vm2  ;;  %v509_v48 = vrot.slane %v505_v36, %v2522_v15  ;;  %v513_v49 = vrot.slane %v505_v36, %v2524_v16  ;;  %v1010_v21 = vld [vmem:[#allocation2 + $0x100] sm:$0xff] }
  0x32   : > { %vm2596_vm2 = vcmp.ne.s16.totalorder %v425_v32, 0  ;;  %v643_v55 = vsel %vm642_vm10, 65537, %v2369_v0 }
  0x33   : > { %270 = vrot.lane.b32.xlu0 %v2479_v2, %s2371_s20  ;;  %v647_v1 = vrot.slane %v643_v55, %v2522_v15  ;;  %v651_v3 = vrot.slane %v643_v55, %v2524_v16  ;;  %s2804_s20 = scalar_lea.hbm %s2851_s4, %s2209_s11 }
  0x35   : > { %404 = vrot.lane.b32.xlu1 %v2479_v2, %s2372_s22  ;;  %vm2671_vm10 = vcmp.ne.s16.totalorder %v647_v1, 0  ;;  %v1026_v1 = vld [vmem:[#allocation2 + $0x180] sm:$0xff] }
  0x37   : > { %402 = vrot.lane.b32.xlu0 %v2482_v4, %s2372_s22  ;;  %s2300_s22 = scalar_lea.vmem %s2806_s12, 512 }
  0x38   : > { %p2301_p6 = scmp.ne.s32.totalorder %s2806_s12, %s2300_s22 }
  0x39   : > { %490 = vrot.lane.b32.xlu1 %v2479_v2, %s2373_s23 }
  0x3a   : > { %p2302_p9 = pnand %p2301_p6, %p2443_p5 }
  0x3b   : > { %488 = vrot.lane.b32.xlu0 %v2482_v4, %s2373_s23  ;;  %s2379_s23 = smov [#allocation5]  }
  0x3c   : > { %p2303_p10 = pneg %p2302_p9 }
  0x3d   : > { %628 = vrot.lane.b32.xlu1 %v2482_v4, %s2374_s27 }
  0x3f   : > { %626 = vrot.lane.b32.xlu0 %v2479_v2, %s2374_s27  ;;  %s2304_s27 = sshll.u32 %s2379_s23, 4  ;;  %s2305_s27 = int_to_ptr.vmem [resolvable:$false] %s2304_s27 }
  0x40   : > { %p2307_p11 = scmp.lt.s32.totalorder %s2806_s12, %s2305_s27 }
  0x41   : > { %712 = vrot.lane.b32.xlu1 %v2482_v4, %s2375_s28 }
  0x43   : > { %710 = vrot.lane.b32.xlu0 %v2479_v2, %s2375_s28  ;;  %s2306_s28 = scalar_lea.vmem %s2305_s27, 1024 }
  0x44   : > { %p2308_p12 = scmp.lt.s32.totalorder %s2306_s28, %s2300_s22 }
  0x45   : > { %798 = vrot.lane.b32.xlu1 %v2482_v4, %s2376_s29 }
  0x46   : > { %p2309_p13 = por %p2308_p12, %p2307_p11 }
  0x47   : > { %796 = vrot.lane.b32.xlu0 %v2479_v2, %s2376_s29 }
  0x48   : > { %p2310_p0 = pnand %p2309_p13, %p2303_p10 }
  0x49   : > { %882 = vrot.lane.b32.xlu1 %v2482_v4, %s2377_s30 }
  0x4b   : > { %880 = vrot.lane.b32.xlu0 %v2479_v2, %s2377_s30 }
  0x4f   : > { %969 = vperm.xlu0 %2272, %v966_v5  }
  0x9f   : > { %v238_v22 = vpop.permute.xlu1 %237 }
  0xa1   : > { %v269_v26 = vpop.permute.xlu0 %268 }
  0xa3   : > { %v235_v29 = vpop.permute.xlu1 %234 }
  0xa4   : > { %v245_v33 = vsel %vm239_vm11, %v235_v29, %v238_v22  ;;  %v240_v34 = vsel %vm239_vm11, %v238_v22, %v235_v29  ;;  %vm300_vm11 = vcmask 31744   ;;  %v2049_v22 = vld [vmem:[%s2848_s1 + $0xc] sm:$0xf] }
  0xa5   : > { %v271_v37 = vpop.permute.xlu0 %270  ;;  %v266_v38 = vsel %vm2545_vm14, %v240_v34, 0  ;;  %v265_v39 = vsel %vm2549_vm0, %v245_v33, 0  ;;  %vm728_vm14 = vmpackc.low %vm2581_vm12, %vm2505_vm1  ;;  %vm492_vm0 = vcmask 7168   ;;  %vm630_vm1 = vcmask 1039360  }
  0xa6   : > { %v278_v40 = vsel %vm272_vm13, %v269_v26, %v271_v37  ;;  %2044 = vmatprep.subr.msk.bf16.mxu1 %vm304_vm15, %v266_v38  ;;  %v356_v41 = vsel %vm304_vm15, %v265_v39, 0  ;;  %v273_v42 = vsel %vm272_vm13, %v271_v37, %v269_v26  ;;  %vm2600_vm13 = vcmp.ne.s16.totalorder %v429_v35, 0 }
  0xa7   : > { %376 = vmatpush1.bf16.msra.mxu1 %v356_v41  ;;  %v297_v44 = vsel %vm2554_vm5, %v273_v42, 0  ;;  %v405_v45 = vpop.permute.xlu1 %404  ;;  %v296_v46 = vsel %vm2558_vm7, %v278_v40, 0  ;;  %vm2624_vm5 = vcmp.ne.s16.totalorder %v509_v48, 0  ;;  %vm2628_vm7 = vcmp.ne.s16.totalorder %v513_v49, 0  ;;  %v2055_v48 = vld [vmem:[%s2848_s1 + $0x14] sm:$0xf] }
  0xa8   : > { %2042 = vmatprep.subr.msk.bf16.mxu0 %vm304_vm15, %v297_v44  ;;  %v306_v50 = vsel %vm304_vm15, %v296_v46, 0  ;;  %v729_v5 = vsel %vm728_vm14, 65537, %v2369_v0  ;;  %vm2675_vm12 = vcmp.ne.s16.totalorder %v651_v3, 0  ;;  %v1038_v46 = vld [vmem:[#allocation2 + $0x1e0] sm:$0xff] }
  0xa9   : > { %326 = vmatpush1.bf16.msra.mxu0 %v306_v50  ;;  %v403_v53 = vpop.permute.xlu0 %402  ;;  %v733_v18 = vrot.slane %v729_v5, %v2522_v15  ;;  %v737_v17 = vrot.slane %v729_v5, %v2524_v16  ;;  %v1030_v3 = vld [vmem:[#allocation2 + $0x1a0] sm:$0xff]  ;;  %v2058_v5 = vld [vmem:[%s2848_s1 + $0x18] sm:$0xf] }
  0xaa   : > { %v407_v56 = vsel %vm406_vm9, %v405_v45, %v403_v53  ;;  %v412_v57 = vsel %vm406_vm9, %v403_v53, %v405_v45  ;;  %2045 = vmatmul.mubr.msk.bf16.vlgmr.msra.gmra.mxu1 %vm300_vm11, %v267_v47  ;;  %vm2648_vm9 = vmpackc.low %vm222_vm3, %vm2378_vm6  ;;  %v1034_v45 = vld [vmem:[#allocation2 + $0x1c0] sm:$0xff]  ;;  %v2052_v47 = vld [vmem:[%s2848_s1 + $0x10] sm:$0xf] }
  0xab   : > { %v432_v58 = vsel %vm2596_vm2, %v412_v57, 0  ;;  %v433_v59 = vsel %vm2600_vm13, %v407_v56, 0  ;;  %v491_v60 = vpop.permute.xlu1 %490  ;;  %561 = vmatprep.mubr.bf16.mxu1 %v2369_v0  ;;  %vm2665_vm6 = vmand %vm222_vm3, %vm2526_vm8  ;;  %v813_v24 = vsel %vm2648_vm9, 65537, %v2369_v0  ;;  %vm714_vm3 = vcmask 924672   ;;  %v982_v56 = vld [vmem:[#allocation2 + $0x20] sm:$0xff] }
  0xac   : > { %2043 = vmatmul.mubr.msk.bf16.vlgmr.msra.gmra.mxu0 %vm300_vm11, %v2041_v54  ;;  %2047 = vmatprep.subr.msk.bf16.mxu0 %vm304_vm15, %v433_v59  ;;  %v440_v63 = vsel %vm304_vm15, %v432_v58, 0  ;;  %vm898_vm8 = vmpackc.low %vm2665_vm6, %vm2515_vm4  ;;  %vm2699_vm2 = vcmp.ne.s16.totalorder %v733_v18, 0  ;;  %vm2706_vm13 = vcmp.ne.s16.totalorder %v737_v17, 0  ;;  %v817_v32 = vrot.slane %v813_v24, %v2522_v15  ;;  %v1014_v17 = vld [vmem:[#allocation2 + $0x120] sm:$0xff] }
  0xad   : > { %460 = vmatpush1.bf16.msra.mxu0 %v440_v63  ;;  %v489_v6 = vpop.permute.xlu0 %488  ;;  %477 = vmatprep.mubr.bf16.mxu0 %v2369_v0  ;;  %v821_v33 = vrot.slane %v813_v24, %v2524_v16  ;;  %v899_v35 = vsel %vm898_vm8, 65537, %v2369_v0  ;;  %vm800_vm4 = vcmask 916480   ;;  %v2124_v54 = vcombine.high %v1034_v45, %v1038_v46  ;;  %v1039_v63 = vld [vmem:[#allocation2 + $0x1e8] sm:$0xff] }
  0xae   : > { %v493_v9 = vsel %vm492_vm0, %v491_v60, %v489_v6  ;;  %v498_v10 = vsel %vm492_vm0, %v489_v6, %v491_v60  ;;  %2053 = vmatprep.subr.msk.bf16.mxu0 %vm304_vm15, %v2482_v4  ;;  %vm2721_vm14 = vcmp.ne.s16.totalorder %v817_v32, 0  ;;  %v903_v43 = vrot.slane %v899_v35, %v2522_v15  ;;  %v2061_v6 = vld [vmem:[%s2848_s1 + $0x1c] sm:$0xf] }
  0xaf   : > { %v516_v11 = vsel %vm2624_vm5, %v498_v10, 0  ;;  %v517_v12 = vsel %vm2628_vm7, %v493_v9, 0  ;;  %v629_v13 = vpop.permute.xlu1 %628  ;;  %vm2725_vm0 = vcmp.ne.s16.totalorder %v821_v33, 0  ;;  %v907_v44 = vrot.slane %v899_v35, %v2524_v16  ;;  %v994_v33 = vld [vmem:[#allocation2 + $0x80] sm:$0xff] }
  0xb0   : > { %2050 = vmatprep.subr.msk.bf16.mxu1 %vm304_vm15, %v517_v12  ;;  %v524_v4 = vsel %vm304_vm15, %v516_v11, 0  ;;  %vm884_vm5 = vcmask 908288   ;;  %vm2745_vm7 = vcmp.ne.s16.totalorder %v903_v43, 0  ;;  %v2123_v9 = vcombine.low %v1034_v45, %v1038_v46  ;;  %v1018_v12 = vld [vmem:[#allocation2 + $0x140] sm:$0xff]  ;;  %v999_v45 = vld [vmem:[#allocation2 + $0xa8] sm:$0xff] }
  0xb1   : > { %544 = vmatpush1.bf16.msra.mxu1 %v524_v4  ;;  %v627_v23 = vpop.permute.xlu0 %626  ;;  %vm909_vm9 = vcmp.ne.s16.totalorder %v907_v44, 0  ;;  %v2126_v10 = vcombine.high %v1035_v62, %v1039_v63  ;;  %v2116_v11 = vcombine.high %v1026_v1, %v1030_v3  ;;  %v2115_v18 = vcombine.low %v1026_v1, %v1030_v3  ;;  %v1031_v4 = vld [vmem:[#allocation2 + $0x1a8] sm:$0xff]  ;;  %v1102_v1 = vld [vmem:[#allocation2 + $0x3e0] sm:$0xff] }
  0xb2   : > { %v631_v26 = vsel %vm630_vm1, %v627_v23, %v629_v13  ;;  %v636_v27 = vsel %vm630_vm1, %v629_v13, %v627_v23  ;;  %v1022_v13 = vld [vmem:[#allocation2 + $0x160] sm:$0xff]  ;;  %v2118_v23 = vcombine.high %v1027_v19, %v1031_v4  ;;  %v2099_v31 = vcombine.low %v1010_v21, %v1014_v17  ;;  %v995_v44 = vld [vmem:[#allocation2 + $0x88] sm:$0xff] }
  0xb3   : > { %v654_v28 = vsel %vm2671_vm10, %v631_v26, 0  ;;  %v655_v29 = vsel %vm2675_vm12, %v636_v27, 0  ;;  %v713_v30 = vpop.permute.xlu1 %712  ;;  %v2108_v20 = vcombine.high %v1018_v12, %v1022_v13  ;;  %v2107_v24 = vcombine.low %v1018_v12, %v1022_v13  ;;  %v1002_v27 = vld [vmem:[#allocation2 + $0xc0] sm:$0xff]  ;;  %v1099_v3 = vld [vmem:[#allocation2 + $0x3c8] sm:$0xff] }
  0xb4   : > { %2048 = vmatmul.mubr.msk.bf16.vlgmr.msra.gmra.mxu0 %vm300_vm11, %v2046_v8  ;;  %2051 = vmatmul.mubr.msk.bf16.vlgmr.msra.gmra.mxu1 %vm300_vm11, %v2049_v22  ;;  %v662_v2 = vsel %vm304_vm15, %v654_v28, 0  ;;  %v2064_v8 = vld [vmem:[%s2848_s1 + $0x20] sm:$0xf]  ;;  %v2125_v22 = vcombine.low %v1035_v62, %v1039_v63  ;;  %v2100_v26 = vcombine.high %v1010_v21, %v1014_v17  ;;  %v1091_v13 = vld [vmem:[#allocation2 + $0x388] sm:$0xff] }
  0xb5   : > { %598 = vmatpush1.bf16.msra.mxu0 %v578_v25  ;;  %2056 = vmatprep.subr.msk.bf16.mxu1 %vm304_vm15, %v655_v29  ;;  %v711_v34 = vpop.permute.xlu0 %710  ;;  %v1019_v25 = vld [vmem:[#allocation2 + $0x148] sm:$0xff]  ;;  %v1006_v28 = vld [vmem:[#allocation2 + $0xe0] sm:$0xff]  ;;  %v2117_v29 = vcombine.low %v1027_v19, %v1031_v4 }
  0xb6   : > { %682 = vmatpush1.bf16.msra.mxu1 %v662_v2  ;;  %v715_v36 = vsel %vm714_vm3, %v711_v34, %v713_v30  ;;  %v720_v37 = vsel %vm714_vm3, %v713_v30, %v711_v34  ;;  %615 = vmatprep.mubr.bf16.mxu0 %v2369_v0  ;;  %v1011_v2 = vld [vmem:[#allocation2 + $0x108] sm:$0xff]  ;;  %v2092_v32 = vcombine.high %v1002_v27, %v1006_v28  ;;  %v998_v34 = vld [vmem:[#allocation2 + $0xa0] sm:$0xff] }
  0xb7   : > { %v740_v38 = vsel %vm2699_vm2, %v715_v36, 0  ;;  %v741_v39 = vsel %vm2706_vm13, %v720_v37, 0  ;;  %699 = vmatprep.mubr.bf16.mxu1 %v2369_v0  ;;  %v799_v40 = vpop.permute.xlu1 %798  ;;  %v2102_v36 = vcombine.high %v1011_v2, %v1015_v14  ;;  %v2091_v37 = vcombine.low %v1002_v27, %v1006_v28  ;;  %v1098_v63 = vld [vmem:[#allocation2 + $0x3c0] sm:$0xff]  ;;  %v1095_v19 = vld [vmem:[#allocation2 + $0x3a8] sm:$0xff] }
  0xb8   : > { %2059 = vmatprep.subr.msk.bf16.mxu0 %vm304_vm15, %v741_v39  ;;  %v748_v50 = vsel %vm304_vm15, %v740_v38, 0  ;;  %v1003_v38 = vld [vmem:[#allocation2 + $0xc8] sm:$0xff]  ;;  %v2101_v41 = vcombine.low %v1011_v2, %v1015_v14  ;;  %v2083_v43 = vcombine.low %v994_v33, %v998_v34  ;;  %v1094_v12 = vld [vmem:[#allocation2 + $0x3a0] sm:$0xff]  ;;  %v2182_v21 = vcombine.high %v1091_v13, %v1095_v19 }
  0xb9   : > { %v797_v49 = vpop.permute.xlu0 %796  ;;  %v1007_v39 = vld [vmem:[#allocation2 + $0xe8] sm:$0xff]  ;;  %v1082_v17 = vld [vmem:[#allocation2 + $0x340] sm:$0xff] }
  0xba   : > { %v801_v51 = vsel %vm800_vm4, %v797_v49, %v799_v40  ;;  %v806_v52 = vsel %vm800_vm4, %v799_v40, %v797_v49  ;;  %v2084_v40 = vcombine.high %v994_v33, %v998_v34  ;;  %v2094_v42 = vcombine.high %v1003_v38, %v1007_v39  ;;  %v986_v49 = vld [vmem:[#allocation2 + $0x40] sm:$0xff] }
  0xbb   : > { %v824_v15 = vsel %vm2721_vm14, %v801_v51, 0  ;;  %v825_v16 = vsel %vm2725_vm0, %v806_v52, 0  ;;  %v883_v53 = vpop.permute.xlu1 %882  ;;  %v2093_v46 = vcombine.low %v1003_v38, %v1007_v39  ;;  %v987_v51 = vld [vmem:[#allocation2 + $0x48] sm:$0xff]  ;;  %v1074_v27 = vld [vmem:[#allocation2 + $0x300] sm:$0xff] }
  0xbc   : > { %2054 = vmatmul.mubr.msk.bf16.vlgmr.msra.gmra.mxu0 %vm300_vm11, %v2052_v47  ;;  %2057 = vmatmul.mubr.msk.bf16.vlgmr.msra.gmra.mxu1 %vm300_vm11, %v2055_v48  ;;  %v832_v55 = vsel %vm304_vm15, %v824_v15, 0  ;;  %v2086_v47 = vcombine.high %v995_v44, %v999_v45  ;;  %v2085_v48 = vcombine.low %v995_v44, %v999_v45  ;;  %v991_v15 = vld [vmem:[#allocation2 + $0x68] sm:$0xff]  ;;  %v1078_v28 = vld [vmem:[#allocation2 + $0x320] sm:$0xff] }
  0xbd   : > { %768 = vmatpush1.bf16.msra.mxu0 %v748_v50  ;;  %2062 = vmatprep.subr.msk.bf16.mxu1 %vm304_vm15, %v825_v16  ;;  %v881_v57 = vpop.permute.xlu0 %880  ;;  %v990_v50 = vld [vmem:[#allocation2 + $0x60] sm:$0xff]  ;;  %v2163_v2 = vcombine.low %v1074_v27, %v1078_v28  ;;  %v1063_v45 = vld [vmem:[#allocation2 + $0x2a8] sm:$0xff] }
  0xbe   : > { %852 = vmatpush1.bf16.msra.mxu1 %v832_v55  ;;  %v885_v58 = vsel %vm884_vm5, %v881_v57, %v883_v53  ;;  %v890_v59 = vsel %vm884_vm5, %v883_v53, %v881_v57  ;;  %785 = vmatprep.mubr.bf16.mxu0 %v2369_v0  ;;  %v2076_v52 = vcombine.high %v986_v49, %v990_v50  ;;  %v978_v55 = vld [vmem:[#allocation2] sm:$0xff]  ;;  %v979_v57 = vld [vmem:[#allocation2 + $0x8] sm:$0xff] }
  0xbf   : > { %v910_v60 = vsel %vm2745_vm7, %v885_v58, 0  ;;  %v911_v61 = vsel %vm909_vm9, %v890_v59, 0  ;;  %869 = vmatprep.mubr.bf16.mxu1 %v2369_v0  ;;  %1746 = vmatprep.subr.bf16.mxu1 %v2124_v54  ;;  %v2075_v16 = vcombine.low %v986_v49, %v990_v50  ;;  %v2077_v53 = vcombine.low %v987_v51, %v991_v15  ;;  %v983_v59 = vld [vmem:[#allocation2 + $0x28] sm:$0xff]  ;;  %v1066_v33 = vld [vmem:[#allocation2 + $0x2c0] sm:$0xff] }
  0xc0   : > { %2065 = vmatprep.subr.msk.bf16.mxu0 %vm304_vm15, %v911_v61  ;;  %v918_v7 = vsel %vm304_vm15, %v910_v60, 0  ;;  %v2078_v54 = vcombine.high %v987_v51, %v991_v15  ;;  %v2068_v58 = vcombine.high %v978_v55, %v982_v56  ;;  %v2067_v60 = vcombine.low %v978_v55, %v982_v56  ;;  %v1070_v34 = vld [vmem:[#allocation2 + $0x2e0] sm:$0xff]  ;;  %v1051_v51 = vld [vmem:[#allocation2 + $0x248] sm:$0xff] }
  0xc1   : > { %v2069_v61 = vcombine.low %v979_v57, %v983_v59  ;;  %v2070_v62 = vcombine.high %v979_v57, %v983_v59  ;;  %v2155_v38 = vcombine.low %v1066_v33, %v1070_v34  ;;  %v1050_v49 = vld [vmem:[#allocation2 + $0x240] sm:$0xff]  ;;  %v1055_v15 = vld [vmem:[#allocation2 + $0x268] sm:$0xff] }
  0xc2   : > { %v1054_v50 = vld [vmem:[#allocation2 + $0x260] sm:$0xff]  ;;  %v1043_v57 = vld [vmem:[#allocation2 + $0x208] sm:$0xff] }
  0xc3   : > { %v1042_v55 = vld [vmem:[#allocation2 + $0x200] sm:$0xff]  ;;  %v1047_v59 = vld [vmem:[#allocation2 + $0x228] sm:$0xff] }
  0xc4   : > { %2060 = vmatmul.mubr.msk.bf16.vlgmr.msra.gmra.mxu0 %vm300_vm11, %v2058_v5  ;;  %2063 = vmatmul.mubr.msk.bf16.vlgmr.msra.gmra.mxu1 %vm300_vm11, %v2061_v6  ;;  %v2188_v5 = vcombine.high %v1098_v63, %v1102_v1  ;;  %v1103_v6 = vld [vmem:[#allocation2 + $0x3e8] sm:$0xff]  ;;  %v1046_v56 = vld [vmem:[#allocation2 + $0x220] sm:$0xff] }
  0xc5   : > { %938 = vmatpush1.bf16.msra.mxu0 %v918_v7  ;;  %955 = vmatprep.mubr.bf16.mxu0 %v2369_v0  ;;  %v1023_v0 = vld [vmem:[#allocation2 + $0x168] sm:$0xff]  ;;  %v2187_v7 = vcombine.low %v1098_v63, %v1102_v1  ;;  %v2769_v63 = vld [vmem:[#allocation2 + $0x1d0] sm:$0xff] }
  0xc6   : > { %1787 = vmatprep.subr.bf16.mxu0 %v2126_v10  ;;  %1747 = vmatpush1.bf16.msra.mxu1 %v2123_v9  ;;  %v2110_v30 = vcombine.high %v1019_v25, %v1023_v0  ;;  %v2109_v35 = vcombine.low %v1019_v25, %v1023_v0  ;;  %v2189_v9 = vcombine.low %v1099_v3, %v1103_v6  ;;  %v2771_v1 = vld [vmem:[#allocation2 + $0x1f0] sm:$0xff] }
  0xc7   : > { %1748 = vmatprep.subr.bf16.mxu1 %v2116_v11  ;;  %v2190_v10 = vcombine.high %v1099_v3, %v1103_v6  ;;  %v1090_v11 = vld [vmem:[#allocation2 + $0x380] sm:$0xff]  ;;  %v2773_v3 = vld [vmem:[#allocation2 + $0x1d8] sm:$0xff] }
  0xc8   : > { %v2179_v4 = vcombine.low %v1090_v11, %v1094_v12  ;;  %v2777_v6 = vld [vmem:[#allocation2 + $0x1f8] sm:$0xff] }
  0xca   : > { %1749 = vmatpush1.bf16.msra.mxu1 %v2115_v18  ;;  %v2180_v18 = vcombine.high %v1090_v11, %v1094_v12 }
  0xcb   : > { %1750 = vmatprep.subr.bf16.mxu1 %v2108_v20  ;;  %v2181_v20 = vcombine.low %v1091_v13, %v1095_v19 }
  0xcc   : > { %2066 = vmatmul.mubr.msk.bf16.vlgmr.msra.gmra.mxu0 %vm300_vm11, %v2064_v8  ;;  %v1086_v8 = vld [vmem:[#allocation2 + $0x360] sm:$0xff] }
  0xcd   : > { %1788 = vmatpush1.bf16.msra.mxu0 %v2125_v22  ;;  %v1083_v22 = vld [vmem:[#allocation2 + $0x348] sm:$0xff]  ;;  %v2171_v25 = vcombine.low %v1082_v17, %v1086_v8 }
  0xce   : > { %1789 = vmatprep.subr.bf16.mxu0 %v2118_v23  ;;  %1751 = vmatpush1.bf16.msra.mxu1 %v2107_v24  ;;  %v2172_v23 = vcombine.high %v1082_v17, %v1086_v8  ;;  %v1087_v24 = vld [vmem:[#allocation2 + $0x368] sm:$0xff] }
  0xcf   : > { %1752 = vmatprep.subr.bf16.mxu1 %v2100_v26  ;;  %v2173_v0 = vcombine.low %v1083_v22, %v1087_v24  ;;  %v2174_v26 = vcombine.high %v1083_v22, %v1087_v24 }
  0xd1   : > { %1790 = vmatpush1.bf16.msra.mxu0 %v2117_v29  ;;  %v1075_v29 = vld [vmem:[#allocation2 + $0x308] sm:$0xff] }
  0xd2   : > { %1791 = vmatprep.subr.bf16.mxu0 %v2110_v30  ;;  %1753 = vmatpush1.bf16.msra.mxu1 %v2099_v31  ;;  %v2164_v30 = vcombine.high %v1074_v27, %v1078_v28  ;;  %v1079_v31 = vld [vmem:[#allocation2 + $0x328] sm:$0xff] }
  0xd3   : > { %1754 = vmatprep.subr.bf16.mxu1 %v2092_v32  ;;  %v2165_v14 = vcombine.low %v1075_v29, %v1079_v31  ;;  %v2166_v32 = vcombine.high %v1075_v29, %v1079_v31 }
  0xd5   : > { %1792 = vmatpush1.bf16.msra.mxu0 %v2109_v35  ;;  %v1067_v35 = vld [vmem:[#allocation2 + $0x2c8] sm:$0xff] }
  0xd6   : > { %1793 = vmatprep.subr.bf16.mxu0 %v2102_v36  ;;  %1755 = vmatpush1.bf16.msra.mxu1 %v2091_v37  ;;  %v2156_v36 = vcombine.high %v1066_v33, %v1070_v34  ;;  %v1071_v37 = vld [vmem:[#allocation2 + $0x2e8] sm:$0xff] }
  0xd7   : > { %1756 = vmatprep.subr.bf16.mxu1 %v2084_v40  ;;  %v2157_v39 = vcombine.low %v1067_v35, %v1071_v37  ;;  %v2158_v40 = vcombine.high %v1067_v35, %v1071_v37 }
  0xd9   : > { %1794 = vmatpush1.bf16.msra.mxu0 %v2101_v41  ;;  %v1058_v41 = vld [vmem:[#allocation2 + $0x280] sm:$0xff] }
  0xda   : > { %1795 = vmatprep.subr.bf16.mxu0 %v2094_v42  ;;  %1757 = vmatpush1.bf16.msra.mxu1 %v2083_v43  ;;  %v1062_v42 = vld [vmem:[#allocation2 + $0x2a0] sm:$0xff]  ;;  %v1059_v43 = vld [vmem:[#allocation2 + $0x288] sm:$0xff] }
  0xdb   : > { %1758 = vmatprep.subr.bf16.mxu1 %v2076_v52  ;;  %v2148_v44 = vcombine.high %v1058_v41, %v1062_v42  ;;  %v2140_v52 = vcombine.high %v1050_v49, %v1054_v50 }
  0xdd   : > { %1796 = vmatpush1.bf16.msra.mxu0 %v2093_v46  ;;  %v2147_v46 = vcombine.low %v1058_v41, %v1062_v42 }
  0xde   : > { %1797 = vmatprep.subr.bf16.mxu0 %v2086_v47  ;;  %1759 = vmatpush1.bf16.msra.mxu1 %v2075_v16  ;;  %v2149_v47 = vcombine.low %v1059_v43, %v1063_v45  ;;  %v2139_v16 = vcombine.low %v1050_v49, %v1054_v50 }
  0xdf   : > { %1760 = vmatprep.subr.bf16.mxu1 %v2068_v58  ;;  %v2132_v58 = vcombine.high %v1042_v55, %v1046_v56 }
  0xe1   : > { %1798 = vmatpush1.bf16.msra.mxu0 %v2085_v48  ;;  %v2150_v48 = vcombine.high %v1059_v43, %v1063_v45 }
  0xe2   : > { %1799 = vmatprep.subr.bf16.mxu0 %v2078_v54  ;;  %1761 = vmatpush1.bf16.msra.mxu1 %v2067_v60  ;;  %v2142_v54 = vcombine.high %v1051_v51, %v1055_v15  ;;  %v2131_v60 = vcombine.low %v1042_v55, %v1046_v56 }
  0xe3   : > { %1762 = vmatprep.subr.bf16.mxu1 %v2188_v5  ;;  %v2128_v5 = vcombine.high %v2769_v63, %v2771_v1 }
  0xe5   : > { %1800 = vmatpush1.bf16.msra.mxu0 %v2077_v53  ;;  %v2141_v53 = vcombine.low %v1051_v51, %v1055_v15 }
  0xe6   : > { %1801 = vmatprep.subr.bf16.mxu0 %v2070_v62  ;;  %1763 = vmatpush2.bf16.msra.mxu1 %v2187_v7  ;;  %v2134_v62 = vcombine.high %v1043_v57, %v1047_v59  ;;  %v2127_v7 = vcombine.low %v2769_v63, %v2771_v1 }
  0xe7   : > { %1764 = vmatprep.subr.bf16.mxu1 %v2180_v18 }
  0xe9   : > { %1802 = vmatpush1.bf16.msra.mxu0 %v2069_v61  ;;  %v2133_v61 = vcombine.low %v1043_v57, %v1047_v59 }
  0xea   : > { %1803 = vmatprep.subr.bf16.mxu0 %v2190_v10  ;;  %1765 = vmatpush2.bf16.msra.mxu1 %v2179_v4  ;;  %v2130_v10 = vcombine.high %v2773_v3, %v2777_v6 }
  0xeb   : > { %1766 = vmatprep.subr.bf16.mxu1 %v2172_v23 }
  0xed   : > { %1804 = vmatpush2.bf16.msra.mxu0 %v2189_v9  ;;  %v2129_v9 = vcombine.low %v2773_v3, %v2777_v6 }
  0xee   : > { %1805 = vmatprep.subr.bf16.mxu0 %v2182_v21  ;;  %1767 = vmatpush2.bf16.msra.mxu1 %v2171_v25 }
  0xef   : > { %1768 = vmatprep.subr.bf16.mxu1 %v2164_v30 }
  0xf1   : > { %1806 = vmatpush2.bf16.msra.mxu0 %v2181_v20 }
  0xf2   : > { %1807 = vmatprep.subr.bf16.mxu0 %v2174_v26  ;;  %1769 = vmatpush2.bf16.msra.mxu1 %v2163_v2 }
  0xf3   : > { %1770 = vmatprep.subr.bf16.mxu1 %v2156_v36 }
  0xf5   : > { %1808 = vmatpush2.bf16.msra.mxu0 %v2173_v0 }
  0xf6   : > { %1809 = vmatprep.subr.bf16.mxu0 %v2166_v32  ;;  %1771 = vmatpush2.bf16.msra.mxu1 %v2155_v38 }
  0xf7   : > { %1772 = vmatprep.subr.bf16.mxu1 %v2148_v44 }
  0xf9   : > { %1810 = vmatpush2.bf16.msra.mxu0 %v2165_v14 }
  0xfa   : > { %1811 = vmatprep.subr.bf16.mxu0 %v2158_v40  ;;  %1773 = vmatpush2.bf16.msra.mxu1 %v2147_v46 }
  0xfb   : > { %1774 = vmatprep.subr.bf16.mxu1 %v2140_v52 }
  0xfd   : > { %1812 = vmatpush2.bf16.msra.mxu0 %v2157_v39 }
  0xfe   : > { %1813 = vmatprep.subr.bf16.mxu0 %v2150_v48  ;;  %1775 = vmatpush2.bf16.msra.mxu1 %v2139_v16 }
  0xff   : > { %1776 = vmatprep.subr.bf16.mxu1 %v2132_v58 }
 0x101   : > { %1814 = vmatpush2.bf16.msra.mxu0 %v2149_v47 }
 0x102   : > { %1815 = vmatprep.subr.bf16.mxu0 %v2142_v54  ;;  %1777 = vmatpush2.bf16.msra.mxu1 %v2131_v60 }
 0x103   : > { %1828 = vmatprep.subr.bf16.mxu1 %v2128_v5 }
 0x105   : > { %1816 = vmatpush2.bf16.msra.mxu0 %v2141_v53  ;;  %v970_v53 = vpop.permute.xlu0 %969 }
 0x106   : > { %1817 = vmatprep.subr.bf16.mxu0 %v2134_v62 }
 0x109   : > { %1818 = vmatpush2.bf16.msra.mxu0 %v2133_v61 }
 0x10a   : > { %1869 = vmatprep.subr.bf16.mxu0 %v2130_v10  ;;  %v1028_v10 = vld [vmem:[#allocation2 + $0x190] sm:$0xff] }
 0x16a   : > { %v395_v11 = vpop.f32.mrf.mxu1 }
 0x16c   : > { %v345_v12 = vpop.f32.mrf.mxu0  ;;  %v397_v13 = vpop.f32.mrf.mxu1 }
 0x16d   : > { %v396_v0 = vadd.f32 %v395_v11, %v345_v12  ;;  %v1032_v11 = vld [vmem:[#allocation2 + $0x1b0] sm:$0xff]  ;;  %v1029_v12 = vld [vmem:[#allocation2 + $0x198] sm:$0xff] }
 0x16e   : > { %v347_v18 = vpop.f32.mrf.mxu0  ;;  %v399_v19 = vpop.f32.mrf.mxu1 }
 0x16f   : > { %v398_v28 = vadd.f32 %v397_v13, %v347_v18  ;;  %v1033_v13 = vld [vmem:[#allocation2 + $0x1b8] sm:$0xff] }
 0x170   : > { %v349_v4 = vpop.f32.mrf.mxu0  ;;  %v400_v20 = vpop.f32.mrf.mxu1 }
 0x171   : > { %v1020_v4 = vld [vmem:[#allocation2 + $0x150] sm:$0xff]  ;;  %v2120_v20 = vcombine.high %v1028_v10, %v1032_v11 }
 0x172   : > { %v350_v21 = vpop.f32.mrf.mxu0 }
 0x173   : > { %v2122_v21 = vcombine.high %v1029_v12, %v1033_v13 }
 0x174   : > { %v479_v17 = vpop.f32.mrf.mxu0  ;;  %v563_v8 = vpop.f32.mrf.mxu1 }
 0x175   : > { %v486_v29 = vadd.f32 %v479_v17, %v396_v0  ;;  %v1024_v17 = vld [vmem:[#allocation2 + $0x170] sm:$0xff] }
 0x176   : > { %v481_v22 = vpop.f32.mrf.mxu0  ;;  %v565_v23 = vpop.f32.mrf.mxu1  ;;  %v2111_v63 = vcombine.low %v1020_v4, %v1024_v17 }
 0x177   : > { %v487_v2 = vadd.f32 %v481_v22, %v398_v28  ;;  %v570_v33 = vadd.f32 %v563_v8, %v486_v29  ;;  %v1021_v8 = vld [vmem:[#allocation2 + $0x158] sm:$0xff] }
 0x178   : > { %v483_v24 = vpop.f32.mrf.mxu0  ;;  %v567_v25 = vpop.f32.mrf.mxu1  ;;  %v1025_v22 = vld [vmem:[#allocation2 + $0x178] sm:$0xff] }
 0x179   : > { %v571_v36 = vadd.f32 %v565_v23, %v487_v2  ;;  %v2119_v23 = vcombine.low %v1028_v10, %v1032_v11  ;;  %v2121_v24 = vcombine.low %v1029_v12, %v1033_v13  ;;  %v2112_v25 = vcombine.high %v1020_v4, %v1024_v17  ;;  %v1013_v28 = vld [vmem:[#allocation2 + $0x118] sm:$0xff]  ;;  %v1092_v10 = vld [vmem:[#allocation2 + $0x390] sm:$0xff] }
 0x17a   : > { %v484_v26 = vpop.f32.mrf.mxu0  ;;  %v568_v27 = vpop.f32.mrf.mxu1  ;;  %v2114_v0 = vcombine.high %v1021_v8, %v1025_v22  ;;  %v1017_v29 = vld [vmem:[#allocation2 + $0x138] sm:$0xff]  ;;  %v2113_v1 = vcombine.low %v1021_v8, %v1025_v22  ;;  %v1096_v11 = vld [vmem:[#allocation2 + $0x3b0] sm:$0xff] }
 0x17b   : > { %v1012_v26 = vld [vmem:[#allocation2 + $0x110] sm:$0xff]  ;;  %v2106_v6 = vcombine.high %v1013_v28, %v1017_v29  ;;  %v1093_v12 = vld [vmem:[#allocation2 + $0x398] sm:$0xff] }
 0x17c   : > { %v617_v30 = vpop.f32.mrf.mxu0  ;;  %v701_v31 = vpop.f32.mrf.mxu1  ;;  %v1016_v27 = vld [vmem:[#allocation2 + $0x130] sm:$0xff]  ;;  %v1097_v13 = vld [vmem:[#allocation2 + $0x3b8] sm:$0xff] }
 0x17d   : > { %v624_v37 = vadd.f32 %v617_v30, %v570_v33  ;;  %v2104_v3 = vcombine.high %v1012_v26, %v1016_v27  ;;  %v1005_v30 = vld [vmem:[#allocation2 + $0xd8] sm:$0xff]  ;;  %v2103_v2 = vcombine.low %v1012_v26, %v1016_v27  ;;  %v1084_v17 = vld [vmem:[#allocation2 + $0x350] sm:$0xff] }
 0x17e   : > { %v619_v14 = vpop.f32.mrf.mxu0  ;;  %v703_v32 = vpop.f32.mrf.mxu1  ;;  %v1088_v8 = vld [vmem:[#allocation2 + $0x370] sm:$0xff]  ;;  %v1085_v22 = vld [vmem:[#allocation2 + $0x358] sm:$0xff] }
 0x17f   : > { %v625_v40 = vadd.f32 %v619_v14, %v571_v36  ;;  %v708_v43 = vadd.f32 %v701_v31, %v624_v37  ;;  %v1009_v31 = vld [vmem:[#allocation2 + $0xf8] sm:$0xff]  ;;  %v2105_v14 = vcombine.low %v1013_v28, %v1017_v29  ;;  %v1076_v27 = vld [vmem:[#allocation2 + $0x310] sm:$0xff] }
 0x180   : > { %v621_v34 = vpop.f32.mrf.mxu0  ;;  %v705_v35 = vpop.f32.mrf.mxu1  ;;  %v2098_v33 = vcombine.high %v1005_v30, %v1009_v31  ;;  %v997_v36 = vld [vmem:[#allocation2 + $0x98] sm:$0xff]  ;;  %v1080_v28 = vld [vmem:[#allocation2 + $0x330] sm:$0xff] }
 0x181   : > { %v709_v46 = vadd.f32 %v703_v32, %v625_v40  ;;  %v996_v34 = vld [vmem:[#allocation2 + $0x90] sm:$0xff]  ;;  %v1001_v37 = vld [vmem:[#allocation2 + $0xb8] sm:$0xff] }
 0x182   : > { %v622_v38 = vpop.f32.mrf.mxu0  ;;  %v706_v39 = vpop.f32.mrf.mxu1  ;;  %v1000_v35 = vld [vmem:[#allocation2 + $0xb0] sm:$0xff]  ;;  %v1077_v29 = vld [vmem:[#allocation2 + $0x318] sm:$0xff] }
 0x183   : > { %v2097_v39 = vcombine.low %v1005_v30, %v1009_v31  ;;  %v2088_v40 = vcombine.high %v996_v34, %v1000_v35  ;;  %v1072_v30 = vld [vmem:[#allocation2 + $0x2f0] sm:$0xff]  ;;  %v1069_v31 = vld [vmem:[#allocation2 + $0x2d8] sm:$0xff] }
 0x184   : > { %v787_v41 = vpop.f32.mrf.mxu0  ;;  %v871_v42 = vpop.f32.mrf.mxu1 }
 0x185   : > { %v794_v47 = vadd.f32 %v787_v41, %v708_v43  ;;  %v2090_v41 = vcombine.high %v997_v36, %v1001_v37  ;;  %v992_v43 = vld [vmem:[#allocation2 + $0x70] sm:$0xff] }
 0x186   : > { %v789_v44 = vpop.f32.mrf.mxu0  ;;  %v873_v45 = vpop.f32.mrf.mxu1 }
 0x187   : > { %v795_v50 = vadd.f32 %v789_v44, %v709_v46  ;;  %v878_v15 = vadd.f32 %v871_v42, %v794_v47  ;;  %v988_v42 = vld [vmem:[#allocation2 + $0x50] sm:$0xff]  ;;  %v989_v44 = vld [vmem:[#allocation2 + $0x58] sm:$0xff]  ;;  %v2087_v46 = vcombine.low %v996_v34, %v1000_v35  ;;  %v2089_v47 = vcombine.low %v997_v36, %v1001_v37 }
 0x188   : > { %v791_v48 = vpop.f32.mrf.mxu0  ;;  %v875_v49 = vpop.f32.mrf.mxu1  ;;  %v1060_v35 = vld [vmem:[#allocation2 + $0x290] sm:$0xff]  ;;  %v1061_v37 = vld [vmem:[#allocation2 + $0x298] sm:$0xff] }
 0x189   : > { %v879_v54 = vadd.f32 %v873_v45, %v795_v50  ;;  %v993_v45 = vld [vmem:[#allocation2 + $0x78] sm:$0xff]  ;;  %v2080_v48 = vcombine.high %v988_v42, %v992_v43  ;;  %v980_v50 = vld [vmem:[#allocation2 + $0x10] sm:$0xff] }
 0x18a   : > { %v792_v51 = vpop.f32.mrf.mxu0  ;;  %v876_v52 = vpop.f32.mrf.mxu1  ;;  %v2082_v49 = vcombine.high %v989_v44, %v993_v45  ;;  %v1064_v36 = vld [vmem:[#allocation2 + $0x2b0] sm:$0xff] }
 0x18b   : > { %v984_v51 = vld [vmem:[#allocation2 + $0x30] sm:$0xff]  ;;  %v981_v52 = vld [vmem:[#allocation2 + $0x18] sm:$0xff] }
 0x18c   : > { %v957_v16 = vpop.f32.mrf.mxu0 }
 0x18d   : > { %v964_v55 = vadd.f32 %v957_v16, %v878_v15  ;;  %v985_v15 = vld [vmem:[#allocation2 + $0x38] sm:$0xff]  ;;  %v2079_v16 = vcombine.low %v988_v42, %v992_v43  ;;  %v1052_v43 = vld [vmem:[#allocation2 + $0x250] sm:$0xff] }
 0x18e   : > { %v959_v56 = vpop.f32.mrf.mxu0 }
 0x18f   : > { %v965_v57 = vadd.f32 %v959_v56, %v879_v54  ;;  %v972_v58 = vadd.f32 %v970_v53, %v964_v55  ;;  %v2072_v54 = vcombine.high %v980_v50, %v984_v51  ;;  %v2074_v55 = vcombine.high %v981_v52, %v985_v15  ;;  %v1100_v56 = vld [vmem:[#allocation2 + $0x3d0] sm:$0xff] }
 0x190   : > { %v961_v59 = vpop.f32.mrf.mxu0 }
 0x191   : > { %v973_v60 = vadd.f32 %v970_v53, %v965_v57  ;;  %v974_v61 = vmax.f32 %v972_v58, 0.0  ;;  %v2081_v53 = vcombine.low %v989_v44, %v993_v45  ;;  %v1104_v57 = vld [vmem:[#allocation2 + $0x3f0] sm:$0xff]  ;;  %v1101_v58 = vld [vmem:[#allocation2 + $0x3d8] sm:$0xff] }
 0x192   : > { %v962_v62 = vpop.f32.mrf.mxu0  ;;  %v1105_v59 = vld [vmem:[#allocation2 + $0x3f8] sm:$0xff]  ;;  %v1056_v44 = vld [vmem:[#allocation2 + $0x270] sm:$0xff] }
 0x193   : > { %v975_v5 = vmax.f32 %v973_v60, 0.0  ;;  %v2785_v19 = vpack.c.bf16 %v974_v61, %v974_v61  ;;  %v2071_v60 = vcombine.low %v980_v50, %v984_v51  ;;  %v2073_v61 = vcombine.low %v981_v52, %v985_v15  ;;  %v1053_v45 = vld [vmem:[#allocation2 + $0x258] sm:$0xff]  ;;  %v1044_v51 = vld [vmem:[#allocation2 + $0x210] sm:$0xff] }
 0x194   : > { %v2192_v62 = vcombine.high %v1100_v56, %v1104_v57  ;;  %v2193_v4 = vcombine.low %v1101_v58, %v1105_v59  ;;  %v1048_v52 = vld [vmem:[#allocation2 + $0x230] sm:$0xff]  ;;  %v1045_v15 = vld [vmem:[#allocation2 + $0x218] sm:$0xff] }
 0x195   : > { %v977_v18 = vpack.c.bf16 %v975_v5, %v975_v5  ;;  %v2194_v5 = vcombine.high %v1101_v58, %v1105_v59 }
 0x197   : > { %1778 = vmatprep.mubr.bf16.mxu1 %v977_v18  ;;  %1819 = vmatprep.mubr.bf16.mxu0 %v977_v18 }
 0x198   : > { %1779 = vmatmul.mubr.bf16.vlgmr.msra.gmra.mxu1 %v2785_v19  ;;  %1820 = vmatmul.mubr.bf16.vlgmr.msra.gmra.mxu0 %v2785_v19 }
 0x199   : > { %1829 = vmatpush1.bf16.msra.mxu1 %v2127_v7  ;;  %1870 = vmatpush1.bf16.msra.mxu0 %v2129_v9  ;;  %v1004_v7 = vld [vmem:[#allocation2 + $0xd0] sm:$0xff] }
 0x19a   : > { %1860 = vmatprep.mubr.bf16.mxu1 %v977_v18  ;;  %1901 = vmatprep.mubr.bf16.mxu0 %v977_v18  ;;  %v1008_v9 = vld [vmem:[#allocation2 + $0xf0] sm:$0xff]  ;;  %v2191_v18 = vcombine.low %v1100_v56, %v1104_v57  ;;  %v2135_v57 = vcombine.low %v1044_v51, %v1048_v52 }
 0x19b   : > { %1830 = vmatprep.subr.bf16.mxu1 %v2120_v20  ;;  %1871 = vmatprep.subr.bf16.mxu0 %v2122_v21  ;;  %v2096_v32 = vcombine.high %v1004_v7, %v1008_v9  ;;  %v2095_v38 = vcombine.low %v1004_v7, %v1008_v9  ;;  %v2184_v20 = vcombine.high %v1092_v10, %v1096_v11  ;;  %v1068_v9 = vld [vmem:[#allocation2 + $0x2d0] sm:$0xff] }
 0x19c   : > { %v2186_v21 = vcombine.high %v1093_v12, %v1097_v13 }
 0x19d   : > { %1831 = vmatpush1.bf16.msra.mxu1 %v2119_v23  ;;  %1872 = vmatpush1.bf16.msra.mxu0 %v2121_v24  ;;  %v1089_v23 = vld [vmem:[#allocation2 + $0x378] sm:$0xff]  ;;  %v2183_v24 = vcombine.low %v1092_v10, %v1096_v11 }
 0x19e   : > { %1832 = vmatprep.subr.bf16.mxu1 %v2112_v25  ;;  %1873 = vmatprep.subr.bf16.mxu0 %v2114_v0  ;;  %v2185_v25 = vcombine.low %v1093_v12, %v1097_v13  ;;  %v2176_v0 = vcombine.high %v1084_v17, %v1088_v8  ;;  %v2178_v26 = vcombine.high %v1085_v22, %v1089_v23 }
 0x1a1   : > { %1833 = vmatpush1.bf16.msra.mxu1 %v2111_v63  ;;  %1874 = vmatpush1.bf16.msra.mxu0 %v2113_v1  ;;  %v1081_v63 = vld [vmem:[#allocation2 + $0x338] sm:$0xff]  ;;  %v2175_v1 = vcombine.low %v1084_v17, %v1088_v8 }
 0x1a2   : > { %1834 = vmatprep.subr.bf16.mxu1 %v2104_v3  ;;  %1875 = vmatprep.subr.bf16.mxu0 %v2106_v6  ;;  %v2177_v3 = vcombine.low %v1085_v22, %v1089_v23  ;;  %v2168_v6 = vcombine.high %v1076_v27, %v1080_v28  ;;  %v2170_v7 = vcombine.high %v1077_v29, %v1081_v63 }
 0x1a5   : > { %1835 = vmatpush1.bf16.msra.mxu1 %v2103_v2  ;;  %1876 = vmatpush1.bf16.msra.mxu0 %v2105_v14  ;;  %v1073_v2 = vld [vmem:[#allocation2 + $0x2f8] sm:$0xff]  ;;  %v2167_v14 = vcombine.low %v1076_v27, %v1080_v28 }
 0x1a6   : > { %1836 = vmatprep.subr.bf16.mxu1 %v2096_v32  ;;  %1877 = vmatprep.subr.bf16.mxu0 %v2098_v33  ;;  %v2169_v32 = vcombine.low %v1077_v29, %v1081_v63  ;;  %v2160_v33 = vcombine.high %v1068_v9, %v1072_v30  ;;  %v2162_v34 = vcombine.high %v1069_v31, %v1073_v2 }
 0x1a9   : > { %1837 = vmatpush1.bf16.msra.mxu1 %v2095_v38  ;;  %1878 = vmatpush1.bf16.msra.mxu0 %v2097_v39  ;;  %v1065_v38 = vld [vmem:[#allocation2 + $0x2b8] sm:$0xff]  ;;  %v2159_v39 = vcombine.low %v1068_v9, %v1072_v30 }
 0x1aa   : > { %1838 = vmatprep.subr.bf16.mxu1 %v2088_v40  ;;  %1879 = vmatprep.subr.bf16.mxu0 %v2090_v41  ;;  %v2161_v40 = vcombine.low %v1069_v31, %v1073_v2  ;;  %v2152_v41 = vcombine.high %v1060_v35, %v1064_v36  ;;  %v2154_v42 = vcombine.high %v1061_v37, %v1065_v38 }
 0x1ad   : > { %1839 = vmatpush1.bf16.msra.mxu1 %v2087_v46  ;;  %1880 = vmatpush1.bf16.msra.mxu0 %v2089_v47  ;;  %v1057_v46 = vld [vmem:[#allocation2 + $0x278] sm:$0xff]  ;;  %v2151_v47 = vcombine.low %v1060_v35, %v1064_v36 }
 0x1ae   : > { %1840 = vmatprep.subr.bf16.mxu1 %v2080_v48  ;;  %1881 = vmatprep.subr.bf16.mxu0 %v2082_v49  ;;  %v2153_v48 = vcombine.low %v1061_v37, %v1065_v38  ;;  %v2144_v49 = vcombine.high %v1052_v43, %v1056_v44  ;;  %v2146_v50 = vcombine.high %v1053_v45, %v1057_v46 }
 0x1b1   : > { %1841 = vmatpush1.bf16.msra.mxu1 %v2079_v16  ;;  %1882 = vmatpush1.bf16.msra.mxu0 %v2081_v53  ;;  %v1049_v16 = vld [vmem:[#allocation2 + $0x238] sm:$0xff]  ;;  %v2143_v53 = vcombine.low %v1052_v43, %v1056_v44 }
 0x1b2   : > { %1842 = vmatprep.subr.bf16.mxu1 %v2072_v54  ;;  %1883 = vmatprep.subr.bf16.mxu0 %v2074_v55  ;;  %v2145_v54 = vcombine.low %v1053_v45, %v1057_v46  ;;  %v2136_v55 = vcombine.high %v1044_v51, %v1048_v52  ;;  %v2138_v56 = vcombine.high %v1045_v15, %v1049_v16 }
 0x1b3   : > { %v2137_v58 = vcombine.low %v1045_v15, %v1049_v16 }
 0x1b5   : > { %1843 = vmatpush1.bf16.msra.mxu1 %v2071_v60  ;;  %1884 = vmatpush1.bf16.msra.mxu0 %v2073_v61 }
 0x1b6   : > { %1844 = vmatprep.subr.bf16.mxu1 %v2192_v62  ;;  %1885 = vmatprep.subr.bf16.mxu0 %v2194_v5 }
 0x1b9   : > { %1845 = vmatpush2.bf16.msra.mxu1 %v2191_v18  ;;  %1886 = vmatpush2.bf16.msra.mxu0 %v2193_v4 }
 0x1ba   : > { %1846 = vmatprep.subr.bf16.mxu1 %v2184_v20  ;;  %1887 = vmatprep.subr.bf16.mxu0 %v2186_v21 }
 0x1bd   : > { %1847 = vmatpush2.bf16.msra.mxu1 %v2183_v24  ;;  %1888 = vmatpush2.bf16.msra.mxu0 %v2185_v25 }
 0x1be   : > { %1848 = vmatprep.subr.bf16.mxu1 %v2176_v0  ;;  %1889 = vmatprep.subr.bf16.mxu0 %v2178_v26 }
 0x1c1   : > { %1849 = vmatpush2.bf16.msra.mxu1 %v2175_v1  ;;  %1890 = vmatpush2.bf16.msra.mxu0 %v2177_v3 }
 0x1c2   : > { %1850 = vmatprep.subr.bf16.mxu1 %v2168_v6  ;;  %1891 = vmatprep.subr.bf16.mxu0 %v2170_v7 }
 0x1c5   : > { %1851 = vmatpush2.bf16.msra.mxu1 %v2167_v14  ;;  %1892 = vmatpush2.bf16.msra.mxu0 %v2169_v32 }
 0x1c6   : > { %1852 = vmatprep.subr.bf16.mxu1 %v2160_v33  ;;  %1893 = vmatprep.subr.bf16.mxu0 %v2162_v34 }
 0x1c9   : > { %1853 = vmatpush2.bf16.msra.mxu1 %v2159_v39  ;;  %1894 = vmatpush2.bf16.msra.mxu0 %v2161_v40 }
 0x1ca   : > { %1854 = vmatprep.subr.bf16.mxu1 %v2152_v41  ;;  %1895 = vmatprep.subr.bf16.mxu0 %v2154_v42 }
 0x1cd   : > { %1855 = vmatpush2.bf16.msra.mxu1 %v2151_v47  ;;  %1896 = vmatpush2.bf16.msra.mxu0 %v2153_v48 }
 0x1ce   : > { %1856 = vmatprep.subr.bf16.mxu1 %v2144_v49  ;;  %1897 = vmatprep.subr.bf16.mxu0 %v2146_v50 }
 0x1d1   : > { %1857 = vmatpush2.bf16.msra.mxu1 %v2143_v53  ;;  %1898 = vmatpush2.bf16.msra.mxu0 %v2145_v54 }
 0x1d2   : > { %1858 = vmatprep.subr.bf16.mxu1 %v2136_v55  ;;  %1899 = vmatprep.subr.bf16.mxu0 %v2138_v56 }
 0x1d5   : > { %1859 = vmatpush2.bf16.msra.mxu1 %v2135_v57  ;;  %1900 = vmatpush2.bf16.msra.mxu0 %v2137_v58 }
 0x1d8   : > { %1861 = vmatmul.mubr.bf16.vlgmr.msra.gmra.mxu1 %v2785_v19  ;;  %1902 = vmatmul.mubr.bf16.vlgmr.msra.gmra.mxu0 %v2785_v19 }
 0x258   : > { %v1780_v59 = vpop.f32.mrf.mxu1  ;;  %v1821_v60 = vpop.f32.mrf.mxu0 }
 0x25a   : > { %v1782_v61 = vpop.f32.mrf.mxu1  ;;  %v1823_v62 = vpop.f32.mrf.mxu0 }
 0x25b   : > { %v2205_v5 = vpack.c.bf16 %v1782_v61, %v1780_v59  ;;  %v2206_v10 = vpack.c.bf16 %v1823_v62, %v1821_v60 }
 0x25c   : > { %v1784_v11 = vpop.f32.mrf.mxu1  ;;  %v1825_v12 = vpop.f32.mrf.mxu0 }
 0x25d   : > { %1942 = vst [vmem:[%s205_s10] sm:$0xff] %v2205_v5  ;;  %1943 = vst [vmem:[%s205_s10 + $0x8] sm:$0xff] %v2206_v10 }
 0x25e   : > { %v1785_v13 = vpop.f32.mrf.mxu1  ;;  %v1826_v18 = vpop.f32.mrf.mxu0 }
 0x298   : > { %v1862_v4 = vpop.f32.mrf.mxu1  ;;  %v1903_v19 = vpop.f32.mrf.mxu0 }
 0x29a   : > { %v1864_v20 = vpop.f32.mrf.mxu1  ;;  %v1905_v21 = vpop.f32.mrf.mxu0 }
 0x29b   : > { %v2207_v17 = vpack.c.bf16 %v1864_v20, %v1862_v4  ;;  %v2208_v8 = vpack.c.bf16 %v1905_v21, %v1903_v19 }
 0x29c   : > { %v1866_v22 = vpop.f32.mrf.mxu1  ;;  %v1907_v23 = vpop.f32.mrf.mxu0 }
 0x29d   : > { %1944 = vst [vmem:[%s205_s10 + $0x10] sm:$0xff] %v2207_v17  ;;  %1945 = vst [vmem:[%s205_s10 + $0x18] sm:$0xff] %v2208_v8 }
 0x29e   : > { %v1867_v24 = vpop.f32.mrf.mxu1  ;;  %v1908_v25 = vpop.f32.mrf.mxu0 }
 0x29f   : > { %2313 = shalt.err (!%p2310_p0)
}
 0x2a0   : > { %s2314_s29 = scalar_lea.hbm %s2804_s20, 512  ;;  %s2318_s6 = scalar_lea.hbm %s2851_s4, 1024 }
 0x2a1   : > { %p2315_p1 = scmp.ne.s32.totalorder %s2804_s20, %s2314_s29  ;;  %p2319_p4 = scmp.lt.s32.totalorder %s2804_s20, %s2851_s4 }
 0x2a2   : > { %p2320_p7 = scmp.lt.s32.totalorder %s2318_s6, %s2314_s29 }
 0x2a3   : > { %p2316_p2 = pnand %p2315_p1, %p2443_p5 }
 0x2a4   : > { %p2321_p8 = por %p2320_p7, %p2319_p4 }
 0x2a5   : > { %p2317_p3 = pneg %p2316_p2 }
 0x2a7   : > { %p2322_p6 = pnand %p2321_p8, %p2317_p3 }
 0x2a9   : > { %2325 = shalt.err (!%p2322_p6)
}
 0x2aa   : > { %2214 = dma.vmem_to_hbm [thread:$0]  (%p2443_p5), %s2806_s12, 512, %s2804_s20, %s1947_s19  }
 0x2ab PF: > { %p2226_p9 = scmp.ge.s32.totalorder %s2364_s18, 2  ;;  %s1973_s9 = sand.u32 1, %s2352_s15  }
 0x2ac   : > { %p2899_p10 = scmp.ne.s32.totalorder %s2853_s26, 0  ;;  %s1974_s10 = scalar_lea.sflag [#allocation4], %s1973_s9 }
 0x2ae   : > { %p2221_p11 = pnand %p2226_p9, %p2899_p10 }
 0x2b0   : > { %p2222_p12 = pneg %p2221_p11 }
 0x2b2   : > { %2347 = dma.done.wait (%p2222_p12), %s1974_s10, 512  }
 0x2b3   : > { %2349 = vsyncadd (%p2222_p12), %s1974_s10, 4294966784  ;;  %p15_p13 = scmp.ge.s32.totalorder %s2430_s21, 4   ;;  %s2900_s15 = smov %s2356_s16 }
 0x2b4   : > { %s2901_s16 = smov %s2360_s17  ;;  %s2902_s17 = smov %s2441_s24 }
 0x2b5   : > { %s2903_s18 = smov %s2430_s21  ;;  %17 = sbr.rel (!%p15_p13) target bundleno = 4 (0x4), region = 84 }
 0x2ba   :  { %1979 = vsyncpa [#allocation3], 1 }
 0x2bb   :  { %1981 = vsyncpa [#allocation3 + $0x1], 1 }
 0x2bc   :  { %1982 = vsyncpa [#allocation4], 1 }
 0x2bd   :  { %1984 = vsyncpa [#allocation4 + $0x1], 1 }

</bundles_post_ra>
